<compile_context>
chip_gen: v6e
topology: v6e:2x2x1
jax: 0.10.0
libtpu: 0.0.40
codegen_flags: <defaults>
</compile_context>

<pallas_src>
import functools

import jax
import jax.numpy as jnp
from jax.experimental import pallas as pl
from jax.experimental.pallas import tpu as pltpu

# ----------------------------- configuration -------------------------------
NUM_LABELS = 3          # MedNLI: entailment / contradiction / neutral
HIDDEN = 768            # BERT hidden size (matches torch.nn.Linear(768, ...))
NUM_LAYERS = 2          # synthetic BERT depth (number of attention tensors)
NUM_HEADS = 4
SEQ_LEN = 8
BATCH = 2
VOCAB = 100
DROPOUT_P = 0.1
PAD_LANES = 128                                    # lane-dense output width
SK_PAD = max(128, ((SEQ_LEN + 127) // 128) * 128)  # key axis padded to 128-lane multiple
ROW_BLOCK_MAX = 1024                               # attention rows per grid step


def _choose_row_block(num_rows):
    """Largest row block <= ROW_BLOCK_MAX that evenly divides num_rows."""
    if num_rows <= ROW_BLOCK_MAX:
        return num_rows
    for cand in (1024, 512, 256, 128, 64, 32, 16, 8):
        if num_rows % cand == 0:
            return cand
    return num_rows  # fallback: single block


# --------------------------- fused Pallas kernel ----------------------------
def _fused_head_kernel(*refs, training):
    """attention key-mean (bf16 matmul) ; pooler(tanh) -> dropout -> classifier.

    Refs (inference): x_cls, w_pool, b_pool, w_cls_pad, b_cls_pad,
                      attn_rows, avg_mat, logits_out, amean_out
    Training adds a leading SMEM seed ref (scalar prefetch).
    """
    if training:
        seed_ref, refs = refs[0], refs[1:]
    (x_ref, wp_ref, bp_ref, wc_ref, bc_ref, attn_ref, avg_ref,
     logits_ref, amean_ref) = refs

    # Attention mean over the key axis for this row block, as a lane-dense
    # bf16 matmul: [rows, S_k_pad] @ [S_k_pad, 128] -> [rows, 128] f32.
    # Every output lane holds the same key-mean; column 0 is sliced outside.
    amean_ref[...] = jnp.dot(attn_ref[...], avg_ref[...],
                             preferred_element_type=jnp.float32)

    # Pooler + dropout + classifier run exactly once (grid step 0).  Their
    # weights have constant block indices, so they stay VMEM-resident and are
    # never re-DMA'd across the attention row steps.
    @pl.when(pl.program_id(0) == 0)
    def _head():
        # pooler: tanh(x_cls @ W_pool + b_pool); bf16 operands, f32 accumulate.
        pooled = jnp.tanh(
            jnp.dot(x_ref[...], wp_ref[...], preferred_element_type=jnp.float32)
            + bp_ref[...])                                  # [B, D] f32

        if training:
            # inverted dropout; mask math kept in f32 (v5e VPU has no bf16).
            # Seeded only here (inside the program_id==0 gate), so masks never
            # repeat across grid steps.
            pltpu.prng_seed(seed_ref[0])
            bits = pltpu.bitcast(pltpu.prng_random_bits(pooled.shape), jnp.uint32)
            thresh = jnp.uint32(int(DROPOUT_P * (2 ** 32)))
            keep = (bits >= thresh).astype(jnp.float32)
            pooled = pooled * keep * (1.0 / (1.0 - DROPOUT_P))

        # classifier: lane-dense [B, 128] logits (columns >= NUM_LABELS are 0).
        logits_ref[...] = (
            jnp.dot(pooled.astype(jnp.bfloat16), wc_ref[...],
                    preferred_element_type=jnp.float32)
            + bc_ref[...])


def fused_head(params, x_cls_bf16, attn_rows, training=False, seed=None):
    """One pallas_call computing (padded logits, padded attention key-mean)."""
    B = x_cls_bf16.shape[0]
    R2, SKP = attn_rows.shape                 # R2 = L*B*H*S rows, SKP = padded keys
    row_block = _choose_row_block(R2)
    num_blocks = R2 // row_block

    const2 = lambda i, *_: (0, 0)             # weights / biases / avg_mat / logits
    rowmap = lambda i, *_: (i, 0)             # streamed attention rows + their mean

    if num_blocks > 1:
        # Constant-index inputs never change block: single-buffer them so the
        # reclaimed VMEM can buffer the streaming attention rows more deeply.
        def wspec(shape):
            return pl.BlockSpec(shape, const2, pipeline_mode=pl.Buffered(1))
    else:
        def wspec(shape):
            return pl.BlockSpec(shape, const2)

    in_specs = [
        wspec((B, HIDDEN)),                   # x_cls      (bf16)
        wspec((HIDDEN, HIDDEN)),              # w_pool     (bf16)
        wspec((1, HIDDEN)),                   # b_pool     (f32)
        wspec((HIDDEN, PAD_LANES)),           # w_cls_pad  (bf16)
        wspec((1, PAD_LANES)),                # b_cls_pad  (f32)
        pl.BlockSpec((row_block, SKP), rowmap),   # attn rows (bf16), streamed
        wspec((SKP, PAD_LANES)),              # avg_mat    (bf16)
    ]
    out_specs = [
        pl.BlockSpec((B, PAD_LANES), const2),        # logits (padded lanes)
        pl.BlockSpec((row_block, PAD_LANES), rowmap),  # attn key-mean (padded lanes)
    ]
    out_shape = (jax.ShapeDtypeStruct((B, PAD_LANES), jnp.float32),
                 jax.ShapeDtypeStruct((R2, PAD_LANES), jnp.float32))

    args = (x_cls_bf16, params["w_pool_bf16"], params["b_pool_row"],
            params["w_cls_pad"], params["b_cls_pad"], attn_rows, params["avg_mat"])
    if training:
        seed_arr = jnp.asarray([0 if seed is None else seed], dtype=jnp.int32)
        args = (seed_arr,) + args

    kernel = functools.partial(_fused_head_kernel, training=training)
    return pl.pallas_call(
        kernel,
        out_shape=out_shape,
        grid_spec=pltpu.PrefetchScalarGridSpec(
            num_scalar_prefetch=1 if training else 0,
            grid=(num_blocks,),
            in_specs=in_specs,
            out_specs=out_specs,
        ),
        # Row axis is "arbitrary": the logits output block is revisited
        # (constant index) across it.  For a real-size megacore split, emit
        # the logits from a separate tiny call and mark this axis "parallel".
        compiler_params=pltpu.CompilerParams(
            dimension_semantics=("arbitrary",)),
    )(*args)


# -------------------- synthetic BERT stand-in (plain-JAX glue) --------------
def init_params(key):
    ks = jax.random.split(key, 12)
    scale = 0.02
    p = {
        "tok_emb": scale * jax.random.normal(ks[0], (VOCAB, HIDDEN), jnp.float32),
        "pos_emb": scale * jax.random.normal(ks[1], (SEQ_LEN, HIDDEN), jnp.float32),
        "seg_emb": scale * jax.random.normal(ks[2], (2, HIDDEN), jnp.float32),
        "wq": scale * jax.random.normal(ks[3], (NUM_LAYERS, HIDDEN, HIDDEN), jnp.float32),
        "wk": scale * jax.random.normal(ks[4], (NUM_LAYERS, HIDDEN, HIDDEN), jnp.float32),
        "wv": scale * jax.random.normal(ks[5], (NUM_LAYERS, HIDDEN, HIDDEN), jnp.float32),
        "w_pool": scale * jax.random.normal(ks[6], (HIDDEN, HIDDEN), jnp.float32),
        "b_pool": jnp.zeros((HIDDEN,), jnp.float32),
        "w_cls": scale * jax.random.normal(ks[7], (HIDDEN, NUM_LABELS), jnp.float32),
        "b_cls": jnp.zeros((NUM_LABELS,), jnp.float32),
    }
    # --- precomputed (hoisted) kernel-side tensors: bf16 MXU operands,
    #     zero-padded lane-dense classifier weight/bias, tiny 1/S averaging
    #     matrix over the (padded) key axis broadcast to 128 lanes. ---
    p["w_pool_bf16"] = p["w_pool"].astype(jnp.bfloat16)
    p["b_pool_row"] = p["b_pool"].reshape(1, HIDDEN)
    p["w_cls_pad"] = (jnp.zeros((HIDDEN, PAD_LANES), jnp.float32)
                      .at[:, :NUM_LABELS].set(p["w_cls"])).astype(jnp.bfloat16)
    p["b_cls_pad"] = (jnp.zeros((1, PAD_LANES), jnp.float32)
                      .at[0, :NUM_LABELS].set(p["b_cls"]))
    key_idx = jnp.arange(SK_PAD)[:, None]                       # [SK_PAD, 1]
    avg_col = jnp.where(key_idx < SEQ_LEN, 1.0 / SEQ_LEN, 0.0)  # zero on pad rows
    p["avg_mat"] = jnp.broadcast_to(avg_col, (SK_PAD, PAD_LANES)).astype(jnp.bfloat16)
    return p


def synthetic_bert(params, token_ids, mask_ids, seg_ids):
    """Deterministic stand-in for nn_bert_model: hidden states + attentions."""
    B, S = token_ids.shape
    dh = HIDDEN // NUM_HEADS
    x = (params["tok_emb"][token_ids]
         + params["pos_emb"][None, :S]
         + params["seg_emb"][seg_ids])                       # [B, S, D]
    attentions = []
    neg = (1.0 - mask_ids[:, None, None, :].astype(jnp.float32)) * -1e9
    for l in range(NUM_LAYERS):
        q = (x @ params["wq"][l]).reshape(B, S, NUM_HEADS, dh).transpose(0, 2, 1, 3)
        k = (x @ params["wk"][l]).reshape(B, S, NUM_HEADS, dh).transpose(0, 2, 1, 3)
        v = (x @ params["wv"][l]).reshape(B, S, NUM_HEADS, dh).transpose(0, 2, 1, 3)
        scores = jnp.einsum("bhqd,bhkd->bhqk", q, k) / jnp.sqrt(jnp.float32(dh))
        probs = jax.nn.softmax(scores + neg, axis=-1)        # [B, H, S, S]
        attentions.append(probs)
        ctx = jnp.einsum("bhqk,bhkd->bhqd", probs, v).transpose(0, 2, 1, 3).reshape(B, S, HIDDEN)
        x = x + ctx
    return x, attentions     # pooler (tanh(x[:,0] @ W + b)) is done in the Pallas kernel


# ----------------------- MedNLIClassifier.forward ---------------------------
def mednli_forward(params, token_ids, mask_ids, seg_ids,
                   loss_type="attention", training=False, seed=None):
    x, attentions = synthetic_bert(params, token_ids, mask_ids, seg_ids)
    x_cls = x[:, 0].astype(jnp.bfloat16)                     # CLS hidden state [B, D]

    attn = jnp.stack(attentions, axis=0)                     # [L, B, H, S, S]
    L, B, H, S, _ = attn.shape
    # bf16 stream, rows = flattened (layer, batch, head, query); key axis
    # zero-padded to a 128-lane multiple (padded keys x 0-rows of avg_mat = 0).
    attn_rows = attn.astype(jnp.bfloat16).reshape(L * B * H * S, S)
    if SK_PAD != S:
        attn_rows = jnp.pad(attn_rows, ((0, 0), (0, SK_PAD - S)))

    logits_pad, amean_pad = fused_head(params, x_cls, attn_rows,
                                       training=training, seed=seed)
    prediction = logits_pad[:, :NUM_LABELS]                  # slice padded lanes
    if loss_type == "task":
        return prediction

    mean = amean_pad[:, 0].reshape(L, B, H, S)               # torch.mean(attn, -1)
    attn_out = jnp.transpose(mean, (1, 0, 2, 3)).reshape(B, L * H, S)
    return prediction, attn_out


# ------------------------------- main ---------------------------------------
if __name__ == "__main__":
    key = jax.random.PRNGKey(0)
    k_param, k_tok, k_seg = jax.random.split(key, 3)

    params = init_params(k_param)
    token_ids = jax.random.randint(k_tok, (BATCH, SEQ_LEN), 0, VOCAB, dtype=jnp.int32)
    mask_ids = jnp.ones((BATCH, SEQ_LEN), dtype=jnp.int32)
    seg_ids = jax.random.randint(k_seg, (BATCH, SEQ_LEN), 0, 2, dtype=jnp.int32)

    fwd = jax.jit(functools.partial(mednli_forward,
                                    loss_type="attention", training=False))
    prediction, attn_out = fwd(params, token_ids, mask_ids, seg_ids)
    jax.block_until_ready(prediction)
    jax.block_until_ready(attn_out)

    assert prediction.shape == (BATCH, NUM_LABELS)
    assert attn_out.shape == (BATCH, NUM_LAYERS * NUM_HEADS, SEQ_LEN)

    # reference check (plain JAX, f32) for pooler + classifier and attention mean
    x_ref, attns_ref = synthetic_bert(params, token_ids, mask_ids, seg_ids)
    pooled_ref = jnp.tanh(x_ref[:, 0] @ params["w_pool"] + params["b_pool"])
    pred_ref = pooled_ref @ params["w_cls"] + params["b_cls"]
    attn_stack = jnp.stack(attns_ref, axis=0)
    attn_ref = jnp.transpose(jnp.mean(attn_stack, axis=-1), (1, 0, 2, 3)).reshape(
        BATCH, NUM_LAYERS * NUM_HEADS, SEQ_LEN)
    assert jnp.allclose(prediction, pred_ref, rtol=2e-2, atol=2e-2)
    assert jnp.allclose(attn_out, attn_ref, rtol=2e-2, atol=3e-3)

    print("KERNEL_OK")
</pallas_src>

<mosaic_0001>
module attributes {stable_mosaic.version = 11 : i64} {
  func.func @_fused_head_kernel(%arg0: i32, %arg1: memref<2x768xbf16, #tpu.memory_space<vmem>>, %arg2: memref<768x768xbf16, #tpu.memory_space<vmem>>, %arg3: memref<1x768xf32, #tpu.memory_space<vmem>>, %arg4: memref<768x128xbf16, #tpu.memory_space<vmem>>, %arg5: memref<1x128xf32, #tpu.memory_space<vmem>>, %arg6: memref<128x128xbf16, #tpu.memory_space<vmem>>, %arg7: memref<128x128xbf16, #tpu.memory_space<vmem>>, %arg8: memref<2x128xf32, #tpu.memory_space<vmem>>, %arg9: memref<128x128xf32, #tpu.memory_space<vmem>>) attributes {dimension_semantics = [#tpu.dimension_semantics<arbitrary>], iteration_bounds = array<i64: 1>, scalar_prefetch = 0 : i64, scratch_operands = 0 : i64, tpu.core_type = #tpu.core_type<tc>, window_params = [{pipeline_mode = #tpu.pipeline_mode<synchronous>, transform_indices = @transform_0, window_bounds = array<i64: 2, 768>}, {pipeline_mode = #tpu.pipeline_mode<synchronous>, transform_indices = @transform_1, window_bounds = array<i64: 768, 768>}, {pipeline_mode = #tpu.pipeline_mode<synchronous>, transform_indices = @transform_2, window_bounds = array<i64: 1, 768>}, {pipeline_mode = #tpu.pipeline_mode<synchronous>, transform_indices = @transform_3, window_bounds = array<i64: 768, 128>}, {pipeline_mode = #tpu.pipeline_mode<synchronous>, transform_indices = @transform_4, window_bounds = array<i64: 1, 128>}, {transform_indices = @transform_5, window_bounds = array<i64: 128, 128>}, {pipeline_mode = #tpu.pipeline_mode<synchronous>, transform_indices = @transform_6, window_bounds = array<i64: 128, 128>}, {pipeline_mode = #tpu.pipeline_mode<synchronous>, transform_indices = @transform_7, window_bounds = array<i64: 2, 128>}, {transform_indices = @transform_8, window_bounds = array<i64: 128, 128>}]} {
    %c0 = arith.constant 0 : index
    %c0_0 = arith.constant 0 : index
    %0 = vector.load %arg6[%c0, %c0_0] : memref<128x128xbf16, #tpu.memory_space<vmem>>, vector<128x128xbf16>
    %c0_1 = arith.constant 0 : index
    %c0_2 = arith.constant 0 : index
    %1 = vector.load %arg7[%c0_1, %c0_2] : memref<128x128xbf16, #tpu.memory_space<vmem>>, vector<128x128xbf16>
    %cst = arith.constant dense<0.000000e+00> : vector<128x128xf32>
    %2 = tpu.matmul %0, %1, %cst {dimension_numbers = #tpu.dot_dimension_numbers<[1], [0], [0], [1], [0, 0, 1, 1], [], []>} : vector<128x128xbf16>, vector<128x128xbf16>, vector<128x128xf32> -> vector<128x128xf32>
    %c0_3 = arith.constant 0 : index
    %c0_4 = arith.constant 0 : index
    %3 = vector.load %arg9[%c0_3, %c0_4] : memref<128x128xf32, #tpu.memory_space<vmem>>, vector<128x128xf32>
    tpu.vector_store %arg9[%c0_3, %c0_4], %2 {strides = array<i32>} : memref<128x128xf32, #tpu.memory_space<vmem>>, vector<128x128xf32>,
    %c0_i32 = arith.constant 0 : i32
    %4 = arith.cmpi eq, %arg0, %c0_i32 : i32
    %5 = arith.extui %4 : i1 to i32
    %c0_i32_5 = arith.constant 0 : i32
    %6 = arith.cmpi ne, %5, %c0_i32_5 : i32
    scf.if %6 {
      %c0_6 = arith.constant 0 : index
      %c0_7 = arith.constant 0 : index
      %7 = vector.load %arg1[%c0_6, %c0_7] : memref<2x768xbf16, #tpu.memory_space<vmem>>, vector<2x768xbf16>
      %c0_8 = arith.constant 0 : index
      %c0_9 = arith.constant 0 : index
      %8 = vector.load %arg2[%c0_8, %c0_9] : memref<768x768xbf16, #tpu.memory_space<vmem>>, vector<768x768xbf16>
      %cst_10 = arith.constant dense<0.000000e+00> : vector<2x768xf32>
      %9 = tpu.matmul %7, %8, %cst_10 {dimension_numbers = #tpu.dot_dimension_numbers<[1], [0], [0], [1], [0, 0, 1, 1], [], []>} : vector<2x768xbf16>, vector<768x768xbf16>, vector<2x768xf32> -> vector<2x768xf32>
      %c0_11 = arith.constant 0 : index
      %c0_12 = arith.constant 0 : index
      %10 = vector.load %arg3[%c0_11, %c0_12] : memref<1x768xf32, #tpu.memory_space<vmem>>, vector<1x768xf32>
      %11 = vector.broadcast %10 : vector<1x768xf32> to vector<2x768xf32>
      %12 = arith.addf %9, %11 : vector<2x768xf32>
      %13 = math.tanh %12 : vector<2x768xf32>
      %14 = arith.truncf %13 : vector<2x768xf32> to vector<2x768xbf16>
      %c0_13 = arith.constant 0 : index
      %c0_14 = arith.constant 0 : index
      %15 = vector.load %arg4[%c0_13, %c0_14] : memref<768x128xbf16, #tpu.memory_space<vmem>>, vector<768x128xbf16>
      %cst_15 = arith.constant dense<0.000000e+00> : vector<2x128xf32>
      %16 = tpu.matmul %14, %15, %cst_15 {dimension_numbers = #tpu.dot_dimension_numbers<[1], [0], [0], [1], [0, 0, 1, 1], [], []>} : vector<2x768xbf16>, vector<768x128xbf16>, vector<2x128xf32> -> vector<2x128xf32>
      %c0_16 = arith.constant 0 : index
      %c0_17 = arith.constant 0 : index
      %17 = vector.load %arg5[%c0_16, %c0_17] : memref<1x128xf32, #tpu.memory_space<vmem>>, vector<1x128xf32>
      %18 = vector.broadcast %17 : vector<1x128xf32> to vector<2x128xf32>
      %19 = arith.addf %16, %18 : vector<2x128xf32>
      %c0_18 = arith.constant 0 : index
      %c0_19 = arith.constant 0 : index
      %20 = vector.load %arg8[%c0_18, %c0_19] : memref<2x128xf32, #tpu.memory_space<vmem>>, vector<2x128xf32>
      tpu.vector_store %arg8[%c0_18, %c0_19], %19 {strides = array<i32>} : memref<2x128xf32, #tpu.memory_space<vmem>>, vector<2x128xf32>,
    } else {
    }
    return
  }
  func.func @transform_0(%arg0: i32) -> (i32, i32) {
    %c0_i32 = arith.constant 0 : i32
    %c0_i32_0 = arith.constant 0 : i32
    %c0_i32_1 = arith.constant 0 : i32
    return %c0_i32, %c0_i32_0 : i32, i32
  }
  func.func @transform_1(%arg0: i32) -> (i32, i32) {
    %c0_i32 = arith.constant 0 : i32
    %c0_i32_0 = arith.constant 0 : i32
    %c0_i32_1 = arith.constant 0 : i32
    return %c0_i32, %c0_i32_0 : i32, i32
  }
  func.func @transform_2(%arg0: i32) -> (i32, i32) {
    %c0_i32 = arith.constant 0 : i32
    %c0_i32_0 = arith.constant 0 : i32
    %c0_i32_1 = arith.constant 0 : i32
    return %c0_i32, %c0_i32_0 : i32, i32
  }
  func.func @transform_3(%arg0: i32) -> (i32, i32) {
    %c0_i32 = arith.constant 0 : i32
    %c0_i32_0 = arith.constant 0 : i32
    %c0_i32_1 = arith.constant 0 : i32
    return %c0_i32, %c0_i32_0 : i32, i32
  }
  func.func @transform_4(%arg0: i32) -> (i32, i32) {
    %c0_i32 = arith.constant 0 : i32
    %c0_i32_0 = arith.constant 0 : i32
    %c0_i32_1 = arith.constant 0 : i32
    return %c0_i32, %c0_i32_0 : i32, i32
  }
  func.func @transform_5(%arg0: i32) -> (i32, i32) {
    %c0_i32 = arith.constant 0 : i32
    %c0_i32_0 = arith.constant 0 : i32
    return %arg0, %c0_i32 : i32, i32
  }
  func.func @transform_6(%arg0: i32) -> (i32, i32) {
    %c0_i32 = arith.constant 0 : i32
    %c0_i32_0 = arith.constant 0 : i32
    %c0_i32_1 = arith.constant 0 : i32
    return %c0_i32, %c0_i32_0 : i32, i32
  }
  func.func @transform_7(%arg0: i32) -> (i32, i32) {
    %c0_i32 = arith.constant 0 : i32
    %c0_i32_0 = arith.constant 0 : i32
    %c0_i32_1 = arith.constant 0 : i32
    return %c0_i32, %c0_i32_0 : i32, i32
  }
  func.func @transform_8(%arg0: i32) -> (i32, i32) {
    %c0_i32 = arith.constant 0 : i32
    %c0_i32_0 = arith.constant 0 : i32
    return %arg0, %c0_i32 : i32, i32
  }
}

</mosaic_0001>

<bundles_post_ra>
// kernel: squeeze.15
= control target key start
LH: loop header
LB: loop body
LE: loop exit
PB: predicated region body
PF: predicated region fallthrough
CT: control target
= control target key end

     0   :  { %s149_s8 = smov 104   ;;  %s150_s9 = smov 112   ;;  %vm8_vm0 = vcmask 64512   ;;  %s204_s0 = inlined_call_operand.vmem [shape: f32[128], index: 0, kind: input, shape index: {}]   ;;  %s205_s1 = inlined_call_operand.vmem [shape: f32[2,2,4,8], index: 1, kind: output, shape index: {}]  }
   0x1   :  { %v5_v0 = vld [vmem:[%s204_s0] sm:$0x1]  ;;  %s148_s0 = smov 120   ;;  %s151_s10 = smov 96  }
   0x2   :  { %6 = vst [vmem:[#allocation1] sm:$0x1] %v5_v0  ;;  %s152_s11 = smov 88   ;;  %s153_s12 = smov 80  }
   0x3   :  { %s154_s13 = smov 72   ;;  %s155_s14 = smov 64  }
   0x4   :  { %s156_s15 = smov 56   ;;  %s157_s16 = smov 48  }
   0x5   :  { %s158_s17 = smov 40   ;;  %s159_s18 = smov 32  }
   0x6   :  { %s160_s19 = smov 24   ;;  %s161_s20 = smov 16  }
   0x7   :  { %s162_s21 = smov 8  }
   0x9   :  { %v10_v1 = vld [vmem:[#allocation1] sm:$0x1]  }
   0xa   :  { %v22_v2 = vld [vmem:[#allocation1] sm:$0x1]   ;;  %11 = vrot.lane.b32.xlu0 %v10_v1, %s148_s0 }
   0xb   :  { %23 = vrot.lane.b32.xlu1 %v22_v2, %s149_s8  ;;  %v16_v3 = vld [vmem:[#allocation1] sm:$0x1]  }
   0xc   :  { %v28_v4 = vld [vmem:[#allocation1] sm:$0x1]  }
   0xd   :  { %v7_v5 = vld [vmem:[#allocation1] sm:$0x1]  }
   0xe   :  { %17 = vrot.lane.b32.xlu0 %v16_v3, %s150_s9  ;;  %v34_v6 = vld [vmem:[#allocation1] sm:$0x1]   ;;  %9 = vst.msk [vmem:[#allocation0] sm:$0x1] %vm8_vm0, %v7_v5  }
   0xf   :  { %29 = vrot.lane.b32.xlu1 %v28_v4, %s151_s10  ;;  %v40_v7 = vld [vmem:[#allocation1] sm:$0x1]  }
  0x10   :  { %v46_v8 = vld [vmem:[#allocation1] sm:$0x1]  }
  0x11   :  { %v52_v9 = vld [vmem:[#allocation1] sm:$0x1]  }
  0x12   :  { %35 = vrot.lane.b32.xlu0 %v34_v6, %s152_s11  ;;  %v58_v10 = vld [vmem:[#allocation1] sm:$0x1]  }
  0x13   :  { %41 = vrot.lane.b32.xlu1 %v40_v7, %s153_s12  ;;  %v64_v11 = vld [vmem:[#allocation1] sm:$0x1]  }
  0x14   :  { %v70_v12 = vld [vmem:[#allocation1] sm:$0x1]  }
  0x15   :  { %v76_v13 = vld [vmem:[#allocation1] sm:$0x1]  }
  0x16   :  { %47 = vrot.lane.b32.xlu0 %v46_v8, %s154_s13  ;;  %v82_v14 = vld [vmem:[#allocation1] sm:$0x1]  }
  0x17   :  { %53 = vrot.lane.b32.xlu1 %v52_v9, %s155_s14  ;;  %v88_v15 = vld [vmem:[#allocation1] sm:$0x1]  }
  0x18   :  { %v94_v16 = vld [vmem:[#allocation1] sm:$0x1]  }
  0x1a   :  { %59 = vrot.lane.b32.xlu0 %v58_v10, %s156_s15 }
  0x1b   :  { %65 = vrot.lane.b32.xlu1 %v64_v11, %s157_s16 }
  0x1e   :  { %71 = vrot.lane.b32.xlu0 %v70_v12, %s158_s17 }
  0x1f   :  { %77 = vrot.lane.b32.xlu1 %v76_v13, %s159_s18 }
  0x22   :  { %83 = vrot.lane.b32.xlu0 %v82_v14, %s160_s19 }
  0x23   :  { %89 = vrot.lane.b32.xlu1 %v88_v15, %s161_s20 }
  0x26   :  { %95 = vrot.lane.b32.xlu0 %v94_v16, %s162_s21 }
  0x7c   :  { %v12_v17 = vpop.permute.xlu0 %11  }
  0x7d   :  { %v24_v18 = vpop.permute.xlu1 %23   ;;  %15 = vst.msk [vmem:[#allocation0 + $0x1] sm:$0x1] %vm8_vm0, %v12_v17  }
  0x7e   :  { %27 = vst.msk [vmem:[#allocation0 + $0x3] sm:$0x1] %vm8_vm0, %v24_v18  }
  0x80   :  { %v18_v19 = vpop.permute.xlu0 %17  }
  0x81   :  { %v30_v20 = vpop.permute.xlu1 %29   ;;  %21 = vst.msk [vmem:[#allocation0 + $0x2] sm:$0x1] %vm8_vm0, %v18_v19  }
  0x82   :  { %33 = vst.msk [vmem:[#allocation0 + $0x8] sm:$0x1] %vm8_vm0, %v30_v20  }
  0x84   :  { %v36_v21 = vpop.permute.xlu0 %35  }
  0x85   :  { %v42_v22 = vpop.permute.xlu1 %41   ;;  %39 = vst.msk [vmem:[#allocation0 + $0x9] sm:$0x1] %vm8_vm0, %v36_v21  }
  0x86   :  { %45 = vst.msk [vmem:[#allocation0 + $0xa] sm:$0x1] %vm8_vm0, %v42_v22  }
  0x88   :  { %v104_v23 = vld [vmem:[#allocation0] sm:$0xf]  ;;  %v48_v24 = vpop.permute.xlu0 %47  }
  0x89   :  { %v54_v25 = vpop.permute.xlu1 %53   ;;  %107 = vst [vmem:[%s205_s1] sm:$0xf] %v104_v23  ;;  %51 = vst.msk [vmem:[#allocation0 + $0xb] sm:$0x1] %vm8_vm0, %v48_v24  }
  0x8a   :  { %57 = vst.msk [vmem:[#allocation0 + $0x10] sm:$0x1] %vm8_vm0, %v54_v25  }
  0x8c   :  { %v60_v26 = vpop.permute.xlu0 %59  }
  0x8d   :  { %v66_v27 = vpop.permute.xlu1 %65   ;;  %63 = vst.msk [vmem:[#allocation0 + $0x11] sm:$0x1] %vm8_vm0, %v60_v26  }
  0x8e   :  { %69 = vst.msk [vmem:[#allocation0 + $0x12] sm:$0x1] %vm8_vm0, %v66_v27  }
  0x90   :  { %v109_v28 = vld [vmem:[#allocation0 + $0x8] sm:$0xf]  ;;  %v72_v29 = vpop.permute.xlu0 %71  }
  0x91   :  { %v78_v30 = vpop.permute.xlu1 %77   ;;  %130 = vst [vmem:[%s205_s1 + $0x4] sm:$0xf] %v109_v28  ;;  %75 = vst.msk [vmem:[#allocation0 + $0x13] sm:$0x1] %vm8_vm0, %v72_v29  }
  0x92   :  { %81 = vst.msk [vmem:[#allocation0 + $0x18] sm:$0x1] %vm8_vm0, %v78_v30  }
  0x94   :  { %v84_v31 = vpop.permute.xlu0 %83  }
  0x95   :  { %v90_v32 = vpop.permute.xlu1 %89   ;;  %87 = vst.msk [vmem:[#allocation0 + $0x19] sm:$0x1] %vm8_vm0, %v84_v31  }
  0x96   :  { %93 = vst.msk [vmem:[#allocation0 + $0x1a] sm:$0x1] %vm8_vm0, %v90_v32  }
  0x98   :  { %v115_v33 = vld [vmem:[#allocation0 + $0x10] sm:$0xf]  ;;  %v96_v34 = vpop.permute.xlu0 %95  }
  0x99   :  { %131 = vst [vmem:[%s205_s1 + $0x8] sm:$0xf] %v115_v33  ;;  %99 = vst.msk [vmem:[#allocation0 + $0x1b] sm:$0x1] %vm8_vm0, %v96_v34  }
  0xa0   :  { %v122_v35 = vld [vmem:[#allocation0 + $0x18] sm:$0xf] }
  0xa1   :  { %132 = vst [vmem:[%s205_s1 + $0xc] sm:$0xf] %v122_v35 }

// kernel: mednli_forward.1
= control target key start
LH: loop header
LB: loop body
LE: loop exit
PB: predicated region body
PF: predicated region fallthrough
CT: control target
= control target key end

     0   :  { %v566_v30 = vlaneseq  ;;  %v4001_v31 = vmov 1966171168   ;;  %s5238_s0 = inlined_call_operand.vmem [shape: bf16[2,768], index: 0, kind: input, shape index: {}]   ;;  %s5239_s1 = inlined_call_operand.vmem [shape: bf16[768,768], index: 1, kind: input, shape index: {}]   ;;  %s5240_s2 = inlined_call_operand.vmem [shape: f32[1,768], index: 2, kind: input, shape index: {}]   ;;  %s5241_s3 = inlined_call_operand.vmem [shape: bf16[768,128], index: 3, kind: input, shape index: {}]   ;;  %s5242_s4 = inlined_call_operand.vmem [shape: f32[1,128], index: 4, kind: input, shape index: {}]   ;;  %s5243_s5 = inlined_call_operand.vmem [shape: bf16[128,128], index: 5, kind: input, shape index: {}]   ;;  %s5244_s6 = inlined_call_operand.vmem [shape: bf16[128,128], index: 6, kind: input, shape index: {}]   ;;  %s5245_s7 = inlined_call_operand.hbm [shape: f32[2,128], index: 7, kind: output, shape index: {0}]   ;;  %s5246_s8 = inlined_call_operand.vmem [shape: f32[128,128], index: 8, kind: output, shape index: {1}]  }
   0x1   :  { %v3470_v0 = vld [vmem:[%s5244_s6 + $0x38] sm:$0xff]   ;;  %v3471_v1 = vld [vmem:[%s5239_s1 + $0x154] ss:$24 sps:$4 sm:$0xff]   ;;  %v3473_v2 = vld [vmem:[%s5239_s1 + $0x150] ss:$24 sps:$4 sm:$0xff]   ;;  %v599_v32 = vunpack.c.l.s4 %v4001_v31 }
   0x2   :  { %3436 = vmatprep.subr.bf16.mxu0 %v3470_v0  ;;  %2090 = vmatprep.subr.bf16.mxu1 %v3471_v1  ;;  %v3474_v3 = vld [vmem:[%s5244_s6 + $0x30] sm:$0xff]   ;;  %v3475_v4 = vld [vmem:[%s5239_s1 + $0x124] ss:$24 sps:$4 sm:$0xff]   ;;  %v3477_v5 = vld [vmem:[%s5239_s1 + $0x120] ss:$24 sps:$4 sm:$0xff]   ;;  %v4147_v36 = vshrl.u32 %v566_v30, 7 }
   0x3   :  { %3437 = vmatpush3.bf16.msra.mxu0 %v3470_v0  ;;  %2091 = vmatpush1.bf16.msra.mxu1 %v3473_v2  ;;  %v3478_v6 = vld [vmem:[%s5244_s6 + $0x28] sm:$0xff]   ;;  %v3482_v9 = vld [vmem:[%s5244_s6 + $0x20] sm:$0xff]   ;;  %v3486_v12 = vld [vmem:[%s5244_s6 + $0x18] sm:$0xff]   ;;  %v600_v37 = vunpack.c.0.s8 %v599_v32 }
   0x4   :  { %3438 = vmatprep.subr.bf16.mxu0 %v3474_v3  ;;  %2092 = vmatprep.subr.bf16.mxu1 %v3475_v4  ;;  %v3479_v7 = vld [vmem:[%s5239_s1 + $0xf4] ss:$24 sps:$4 sm:$0xff]   ;;  %v3481_v8 = vld [vmem:[%s5239_s1 + $0xf0] ss:$24 sps:$4 sm:$0xff]   ;;  %v3483_v10 = vld [vmem:[%s5239_s1 + $0xc4] ss:$24 sps:$4 sm:$0xff]  }
   0x5   :  { %v3485_v11 = vld [vmem:[%s5239_s1 + $0xc0] ss:$24 sps:$4 sm:$0xff]   ;;  %v3487_v13 = vld [vmem:[%s5239_s1 + $0x94] ss:$24 sps:$4 sm:$0xff]   ;;  %v3489_v14 = vld [vmem:[%s5239_s1 + $0x90] ss:$24 sps:$4 sm:$0xff]   ;;  %v4165_v43 = vsub.s32 %v600_v37, %v4147_v36 }
   0x6   :  { %v3490_v15 = vld [vmem:[%s5244_s6 + $0x10] sm:$0xff]   ;;  %v3491_v16 = vld [vmem:[%s5239_s1 + $0x64] ss:$24 sps:$4 sm:$0xff]   ;;  %v3493_v17 = vld [vmem:[%s5239_s1 + $0x60] ss:$24 sps:$4 sm:$0xff]  }
   0x7   :  { %3439 = vmatpush3.bf16.msra.mxu0 %v3474_v3  ;;  %2093 = vmatpush1.bf16.msra.mxu1 %v3477_v5  ;;  %v3502_v18 = vld [vmem:[%s5243_s5] sm:$0xff]   ;;  %v3494_v19 = vld [vmem:[%s5244_s6 + $0x8] sm:$0xff]   ;;  %v3564_v61 = vld [vmem:[%s5243_s5 + $0x10] sm:$0xff]  }
   0x8   :  { %3440 = vmatprep.subr.bf16.mxu0 %v3478_v6  ;;  %2094 = vmatprep.subr.bf16.mxu1 %v3479_v7  ;;  %v3495_v20 = vld [vmem:[%s5239_s1 + $0x34] ss:$24 sps:$4 sm:$0xff]   ;;  %v3497_v21 = vld [vmem:[%s5239_s1 + $0x30] ss:$24 sps:$4 sm:$0xff]   ;;  %v3498_v22 = vld [vmem:[%s5244_s6] sm:$0xff]  }
   0x9   :  { %3452 = vmatprep.mubr.bf16.mxu0 %v3502_v18  ;;  %v3499_v23 = vld [vmem:[%s5239_s1 + $0x4] ss:$24 sps:$4 sm:$0xff]   ;;  %v3501_v24 = vld [vmem:[%s5239_s1] ss:$24 sps:$4 sm:$0xff]   ;;  %v3507_v25 = vld [vmem:[%s5239_s1 + $0x454] ss:$24 sps:$4 sm:$0xff]  }
   0xa   :  { %v3503_v26 = vld [vmem:[%s5239_s1 + $0x2d4] ss:$24 sps:$4 sm:$0xff]   ;;  %v3505_v27 = vld [vmem:[%s5239_s1 + $0x450] ss:$24 sps:$4 sm:$0xff]   ;;  %v3514_v33 = vld [vmem:[%s5239_s1 + $0x424] ss:$24 sps:$4 sm:$0xff]  }
   0xb   :  { %3441 = vmatpush3.bf16.msra.mxu0 %v3478_v6  ;;  %2095 = vmatpush1.bf16.msra.mxu1 %v3481_v8  ;;  %v3508_v28 = vld [vmem:[%s5243_s5 + $0x8] sm:$0xff]   ;;  %v3510_v34 = vld [vmem:[%s5239_s1 + $0x2a4] ss:$24 sps:$4 sm:$0xff]   ;;  %v3512_v35 = vld [vmem:[%s5239_s1 + $0x420] ss:$24 sps:$4 sm:$0xff]  }
   0xc   :  { %3442 = vmatprep.subr.bf16.mxu0 %v3482_v9  ;;  %2096 = vmatprep.subr.bf16.mxu1 %v3483_v10  ;;  %v3509_v29 = vld [vmem:[%s5239_s1 + $0x2d0] ss:$24 sps:$4 sm:$0xff]   ;;  %v3515_v38 = vld [vmem:[%s5239_s1 + $0x2a0] ss:$24 sps:$4 sm:$0xff]   ;;  %v3520_v39 = vld [vmem:[%s5239_s1 + $0x3f4] ss:$24 sps:$4 sm:$0xff]  }
   0xd   :  { %v3516_v40 = vld [vmem:[%s5239_s1 + $0x274] ss:$24 sps:$4 sm:$0xff]   ;;  %v3518_v41 = vld [vmem:[%s5239_s1 + $0x3f0] ss:$24 sps:$4 sm:$0xff]   ;;  %v3526_v44 = vld [vmem:[%s5239_s1 + $0x3c4] ss:$24 sps:$4 sm:$0xff]  }
   0xe   :  { %v3521_v42 = vld [vmem:[%s5239_s1 + $0x270] ss:$24 sps:$4 sm:$0xff]   ;;  %v3522_v45 = vld [vmem:[%s5239_s1 + $0x244] ss:$24 sps:$4 sm:$0xff]   ;;  %v3524_v47 = vld [vmem:[%s5239_s1 + $0x3c0] ss:$24 sps:$4 sm:$0xff]  }
   0xf   :  { %3443 = vmatpush3.bf16.msra.mxu0 %v3482_v9  ;;  %2097 = vmatpush1.bf16.msra.mxu1 %v3485_v11  ;;  %v275_v46 = vld [vmem:[%s5238_s0] sm:$0x3f]  ;;  %v3528_v51 = vld [vmem:[%s5239_s1 + $0x214] ss:$24 sps:$4 sm:$0xff]   ;;  %v3530_v53 = vld [vmem:[%s5239_s1 + $0x390] ss:$24 sps:$4 sm:$0xff]  }
  0x10   :  { %3444 = vmatprep.subr.bf16.mxu0 %v3486_v12  ;;  %2098 = vmatprep.subr.bf16.mxu1 %v3487_v13  ;;  %v3527_v48 = vld [vmem:[%s5239_s1 + $0x240] ss:$24 sps:$4 sm:$0xff]   ;;  %v604_v49 = vrot.slane %v275_v46, %v4165_v43  ;;  %v597_v50 = vcombine.high %v275_v46, %v275_v46  ;;  %v3532_v52 = vld [vmem:[%s5239_s1 + $0x394] ss:$24 sps:$4 sm:$0xff]   ;;  %v3533_v56 = vld [vmem:[%s5239_s1 + $0x210] ss:$24 sps:$4 sm:$0xff]  }
  0x11   :  { %v3534_v57 = vld [vmem:[%s5239_s1 + $0x1e4] ss:$24 sps:$4 sm:$0xff]   ;;  %v3536_v63 = vld [vmem:[%s5239_s1 + $0x360] ss:$24 sps:$4 sm:$0xff]   ;;  %v3544_v1 = vld [vmem:[%s5239_s1 + $0x334] ss:$24 sps:$4 sm:$0xff]  }
  0x12   :  { %v612_v54 = vcombine.high %v604_v49, %v604_v49  ;;  %v611_v55 = vrot.slane %v597_v50, %v4165_v43  ;;  %v3538_v58 = vld [vmem:[%s5239_s1 + $0x364] ss:$24 sps:$4 sm:$0xff]   ;;  %v3539_v0 = vld [vmem:[%s5239_s1 + $0x1e0] ss:$24 sps:$4 sm:$0xff]   ;;  %v3540_v2 = vld [vmem:[%s5239_s1 + $0x1b4] ss:$24 sps:$4 sm:$0xff]  }
  0x13   :  { %3445 = vmatpush3.bf16.msra.mxu0 %v3486_v12  ;;  %2099 = vmatpush1.bf16.msra.mxu1 %v3489_v14  ;;  %v3565_v62 = vld [vmem:[%s5243_s5 + $0x18] sm:$0xff]   ;;  %v3542_v3 = vld [vmem:[%s5239_s1 + $0x330] ss:$24 sps:$4 sm:$0xff]   ;;  %v3578_v6 = vld [vmem:[%s5243_s5 + $0x20] sm:$0xff]  }
  0x14   :  { %3446 = vmatprep.subr.bf16.mxu0 %v3490_v15  ;;  %2100 = vmatprep.subr.bf16.mxu1 %v3491_v16  ;;  %v4203_v59 = vrot.slane %v612_v54, %v4165_v43  ;;  %v4206_v60 = vrot.slane %v611_v55, %v4165_v43  ;;  %v3545_v4 = vld [vmem:[%s5239_s1 + $0x1b0] ss:$24 sps:$4 sm:$0xff]   ;;  %v3546_v5 = vld [vmem:[%s5239_s1 + $0x184] ss:$24 sps:$4 sm:$0xff]   ;;  %v3548_v9 = vld [vmem:[%s5239_s1 + $0x300] ss:$24 sps:$4 sm:$0xff]   ;;  %v4264_v16 = vrot.slane %v604_v49, %v4165_v43 }
  0x15   :  { %v3550_v7 = vld [vmem:[%s5239_s1 + $0x304] ss:$24 sps:$4 sm:$0xff]   ;;  %v3579_v8 = vld [vmem:[%s5243_s5 + $0x28] sm:$0xff]   ;;  %v3551_v10 = vld [vmem:[%s5239_s1 + $0x180] ss:$24 sps:$4 sm:$0xff]  }
  0x16   :  { %2122 = vmatprep.mubr.bf16.mxu1 %v4203_v59  ;;  %v3554_v11 = vld [vmem:[%s5239_s1 + $0x5d4] ss:$24 sps:$4 sm:$0xff]   ;;  %v3552_v12 = vld [vmem:[%s5239_s1 + $0x5d0] ss:$24 sps:$4 sm:$0xff]   ;;  %v3560_v18 = vld [vmem:[%s5239_s1 + $0x5a4] ss:$24 sps:$4 sm:$0xff]  }
  0x17   :  { %3447 = vmatpush3.bf16.msra.mxu0 %v3490_v15  ;;  %2101 = vmatpush1.bf16.msra.mxu1 %v3493_v17  ;;  %v3557_v13 = vld [vmem:[%s5239_s1 + $0x754] ss:$24 sps:$4 sm:$0xff]   ;;  %v3555_v14 = vld [vmem:[%s5239_s1 + $0x750] ss:$24 sps:$4 sm:$0xff]   ;;  %v613_v15 = vcombine.high %v611_v55, %v611_v55  ;;  %v3577_v30 = vld [vmem:[%s5239_s1 + $0x6c4] ss:$24 sps:$4 sm:$0xff]  }
  0x18   :  { %3448 = vmatprep.subr.bf16.mxu0 %v3494_v19  ;;  %2102 = vmatprep.subr.bf16.mxu1 %v3495_v20  ;;  %v3592_v17 = vld [vmem:[%s5243_s5 + $0x30] sm:$0xff]   ;;  %v3593_v20 = vld [vmem:[%s5243_s5 + $0x38] sm:$0xff]   ;;  %v3617_v55 = vld [vmem:[%s5239_s1 + $0x12c] ss:$24 sps:$4 sm:$0xff]  }
  0x19   :  { %v3572_v31 = vld [vmem:[%s5239_s1 + $0x540] ss:$24 sps:$4 sm:$0xff]   ;;  %v3583_v37 = vld [vmem:[%s5239_s1 + $0x690] ss:$24 sps:$4 sm:$0xff]   ;;  %v3602_v46 = vld [vmem:[%s5239_s1 + $0x484] ss:$24 sps:$4 sm:$0xff]  }
  0x1a   :  { %v3575_v32 = vld [vmem:[%s5239_s1 + $0x6c0] ss:$24 sps:$4 sm:$0xff]   ;;  %v3611_v50 = vld [vmem:[%s5239_s1 + $0x15c] ss:$24 sps:$4 sm:$0xff]  }
  0x1b   :  { %3449 = vmatpush3.bf16.msra.mxu0 %v3494_v19  ;;  %2103 = vmatpush1.bf16.msra.mxu1 %v3497_v21  ;;  %v3563_v19 = vld [vmem:[%s5239_s1 + $0x724] ss:$24 sps:$4 sm:$0xff]   ;;  %v3558_v21 = vld [vmem:[%s5239_s1 + $0x5a0] ss:$24 sps:$4 sm:$0xff]  }
  0x1c   :  { %3450 = vmatprep.subr.bf16.mxu0 %v3498_v22  ;;  %2104 = vmatprep.subr.bf16.mxu1 %v3499_v23  ;;  %v4286_v23 = vrot.slane %v613_v15, %v4165_v43  ;;  %v3599_v43 = vld [vmem:[%s5239_s1 + $0x634] ss:$24 sps:$4 sm:$0xff]   ;;  %v3603_v49 = vld [vmem:[%s5239_s1 + $0x600] ss:$24 sps:$4 sm:$0xff]   ;;  %v3642_v15 = vld [vmem:[%s5239_s1 + $0x7b0] ss:$24 sps:$4 sm:$0xff]  }
  0x1d   :  { %v3609_v54 = vld [vmem:[%s5239_s1 + $0x158] ss:$24 sps:$4 sm:$0xff]  }
  0x1f   :  { %3451 = vmatpush3.bf16.msra.mxu0 %v3498_v22  ;;  %2105 = vmatpush1.bf16.msra.mxu1 %v3501_v24  ;;  %v4283_v22 = vcombine.high %v4203_v59, %v4203_v59  ;;  %v3561_v24 = vld [vmem:[%s5239_s1 + $0x720] ss:$24 sps:$4 sm:$0xff]  }
  0x20   :  { %2131 = vmatprep.subr.bf16.mxu0 %v3507_v25  ;;  %2106 = vmatprep.subr.bf16.mxu1 %v3503_v26  ;;  %v3568_v25 = vld [vmem:[%s5239_s1 + $0x574] ss:$24 sps:$4 sm:$0xff]  }
  0x21   :  { %v3571_v26 = vld [vmem:[%s5239_s1 + $0x6f4] ss:$24 sps:$4 sm:$0xff]  }
  0x22   :  { %3453 = vmatmul.mubr.bf16.vlgmr.msra.gmra.mxu0 %v3508_v28  ;;  %v3569_v28 = vld [vmem:[%s5239_s1 + $0x6f0] ss:$24 sps:$4 sm:$0xff]  }
  0x23   :  { %2132 = vmatpush1.bf16.msra.mxu0 %v3505_v27  ;;  %2107 = vmatpush2.bf16.msra.mxu1 %v3509_v29  ;;  %v3566_v27 = vld [vmem:[%s5239_s1 + $0x570] ss:$24 sps:$4 sm:$0xff]   ;;  %v3574_v29 = vld [vmem:[%s5239_s1 + $0x544] ss:$24 sps:$4 sm:$0xff]  }
  0x24   :  { %2133 = vmatprep.subr.bf16.mxu0 %v3514_v33  ;;  %2108 = vmatprep.subr.bf16.mxu1 %v3510_v34  ;;  %v3582_v33 = vld [vmem:[%s5239_s1 + $0x514] ss:$24 sps:$4 sm:$0xff]  }
  0x25   :  { %3456 = vmatprep.mubr.bf16.mxu0 %v3564_v61  ;;  %v3585_v34 = vld [vmem:[%s5239_s1 + $0x694] ss:$24 sps:$4 sm:$0xff]  }
  0x26   :  { %v3623_v61 = vld [vmem:[%s5239_s1 + $0xfc] ss:$24 sps:$4 sm:$0xff]  }
  0x27   :  { %2134 = vmatpush1.bf16.msra.mxu0 %v3512_v35  ;;  %2109 = vmatpush2.bf16.msra.mxu1 %v3515_v38  ;;  %v3580_v35 = vld [vmem:[%s5239_s1 + $0x510] ss:$24 sps:$4 sm:$0xff]   ;;  %v3588_v38 = vld [vmem:[%s5239_s1 + $0x4e4] ss:$24 sps:$4 sm:$0xff]  }
  0x28   :  { %2135 = vmatprep.subr.bf16.mxu0 %v3520_v39  ;;  %2110 = vmatprep.subr.bf16.mxu1 %v3516_v40  ;;  %v3591_v39 = vld [vmem:[%s5239_s1 + $0x664] ss:$24 sps:$4 sm:$0xff]   ;;  %v3586_v40 = vld [vmem:[%s5239_s1 + $0x4e0] ss:$24 sps:$4 sm:$0xff]  }
  0x2a   :  { %3457 = vmatmul.mubr.bf16.gmra.mxu0 %v3565_v62  ;;  %v3620_v62 = vld [vmem:[%s5239_s1 + $0x874] ss:$24 sps:$4 sm:$0xff]  }
  0x2b   :  { %2136 = vmatpush1.bf16.msra.mxu0 %v3518_v41  ;;  %2111 = vmatpush2.bf16.msra.mxu1 %v3521_v42  ;;  %v3589_v41 = vld [vmem:[%s5239_s1 + $0x660] ss:$24 sps:$4 sm:$0xff]   ;;  %v3596_v42 = vld [vmem:[%s5239_s1 + $0x4b4] ss:$24 sps:$4 sm:$0xff]  }
  0x2c   :  { %2137 = vmatprep.subr.bf16.mxu0 %v3526_v44  ;;  %2112 = vmatprep.subr.bf16.mxu1 %v3522_v45  ;;  %v3594_v44 = vld [vmem:[%s5239_s1 + $0x4b0] ss:$24 sps:$4 sm:$0xff]  }
  0x2d   :  { %3460 = vmatprep.mubr.bf16.mxu0 %v3578_v6  ;;  %v3597_v45 = vld [vmem:[%s5239_s1 + $0x630] ss:$24 sps:$4 sm:$0xff]   ;;  %v3632_v6 = vld [vmem:[%s5239_s1 + $0x814] ss:$24 sps:$4 sm:$0xff]  }
  0x2f   :  { %2138 = vmatpush1.bf16.msra.mxu0 %v3524_v47  ;;  %2113 = vmatpush2.bf16.msra.mxu1 %v3527_v48  ;;  %v3605_v47 = vld [vmem:[%s5239_s1 + $0x604] ss:$24 sps:$4 sm:$0xff]   ;;  %v3600_v48 = vld [vmem:[%s5239_s1 + $0x480] ss:$24 sps:$4 sm:$0xff]  }
  0x30   :  { %2139 = vmatprep.subr.bf16.mxu0 %v3532_v52  ;;  %2114 = vmatprep.subr.bf16.mxu1 %v3528_v51  ;;  %v3608_v51 = vld [vmem:[%s5239_s1 + $0x8d4] ss:$24 sps:$4 sm:$0xff]   ;;  %v4374_v52 = vcombine.high %v4264_v16, %v4264_v16 }
  0x32   :  { %3461 = vmatmul.mubr.bf16.gmra.mxu0 %v3579_v8  ;;  %v3633_v8 = vld [vmem:[%s5239_s1 + $0x98] ss:$24 sps:$4 sm:$0xff]  }
  0x33   :  { %2140 = vmatpush1.bf16.msra.mxu0 %v3530_v53  ;;  %2115 = vmatpush2.bf16.msra.mxu1 %v3533_v56  ;;  %v3606_v53 = vld [vmem:[%s5239_s1 + $0x8d0] ss:$24 sps:$4 sm:$0xff]   ;;  %v3614_v56 = vld [vmem:[%s5239_s1 + $0x8a4] ss:$24 sps:$4 sm:$0xff]  }
  0x34   :  { %2141 = vmatprep.subr.bf16.mxu0 %v3538_v58  ;;  %2116 = vmatprep.subr.bf16.mxu1 %v3534_v57  ;;  %v3612_v57 = vld [vmem:[%s5239_s1 + $0x8a0] ss:$24 sps:$4 sm:$0xff]  }
  0x35   :  { %3464 = vmatprep.mubr.bf16.mxu0 %v3592_v17  ;;  %v3615_v58 = vld [vmem:[%s5239_s1 + $0x128] ss:$24 sps:$4 sm:$0xff]   ;;  %v3645_v17 = vld [vmem:[%s5239_s1 + $0x38] ss:$24 sps:$4 sm:$0xff]  }
  0x37   :  { %2142 = vmatpush1.bf16.msra.mxu0 %v3536_v63  ;;  %2117 = vmatpush2.bf16.msra.mxu1 %v3539_v0  ;;  %v3618_v63 = vld [vmem:[%s5239_s1 + $0x870] ss:$24 sps:$4 sm:$0xff]  }
  0x38   :  { %2143 = vmatprep.subr.bf16.mxu0 %v3544_v1  ;;  %2118 = vmatprep.subr.bf16.mxu1 %v3540_v2  ;;  %v3621_v0 = vld [vmem:[%s5239_s1 + $0xf8] ss:$24 sps:$4 sm:$0xff]   ;;  %v3629_v1 = vld [vmem:[%s5239_s1 + $0xcc] ss:$24 sps:$4 sm:$0xff]  }
  0x39   :  { %v3626_v2 = vld [vmem:[%s5239_s1 + $0x844] ss:$24 sps:$4 sm:$0xff]  }
  0x3a   :  { %3465 = vmatmul.mubr.bf16.gmra.mxu0 %v3593_v20  ;;  %v3648_v20 = vld [vmem:[%s5239_s1 + $0x780] ss:$24 sps:$4 sm:$0xff]  }
  0x3b   :  { %2144 = vmatpush1.bf16.msra.mxu0 %v3542_v3  ;;  %2119 = vmatpush2.bf16.msra.mxu1 %v3545_v4  ;;  %v3624_v3 = vld [vmem:[%s5239_s1 + $0x840] ss:$24 sps:$4 sm:$0xff]  }
  0x3c   :  { %2145 = vmatprep.subr.bf16.mxu0 %v3550_v7  ;;  %2120 = vmatprep.subr.bf16.mxu1 %v3546_v5  ;;  %v3627_v4 = vld [vmem:[%s5239_s1 + $0xc8] ss:$24 sps:$4 sm:$0xff]   ;;  %v3635_v5 = vld [vmem:[%s5239_s1 + $0x9c] ss:$24 sps:$4 sm:$0xff]  }
  0x3d   :  { %2163 = vmatprep.mubr.bf16.mxu0 %v4283_v22  ;;  %v3630_v7 = vld [vmem:[%s5239_s1 + $0x810] ss:$24 sps:$4 sm:$0xff]  }
  0x3f   :  { %2146 = vmatpush1.bf16.msra.mxu0 %v3548_v9  ;;  %2121 = vmatpush2.bf16.msra.mxu1 %v3551_v10  ;;  %v3641_v9 = vld [vmem:[%s5239_s1 + $0x6c] ss:$24 sps:$4 sm:$0xff]  }
  0x40   :  { %2147 = vmatprep.subr.bf16.mxu0 %v3554_v11  ;;  %2172 = vmatprep.subr.bf16.mxu1 %v3557_v13  ;;  %v3638_v10 = vld [vmem:[%s5239_s1 + $0x7e4] ss:$24 sps:$4 sm:$0xff]   ;;  %v3636_v11 = vld [vmem:[%s5239_s1 + $0x7e0] ss:$24 sps:$4 sm:$0xff]  }
  0x41   :  { %v3647_v13 = vld [vmem:[%s5239_s1 + $0x3c] ss:$24 sps:$4 sm:$0xff]  }
  0x42   :  { %2123 = vmatmul.mubr.bf16.vlgmr.msra.gmra.mxu1 %v4264_v16 }
  0x43   :  { %2148 = vmatpush2.bf16.msra.mxu0 %v3552_v12  ;;  %2173 = vmatpush1.bf16.msra.mxu1 %v3555_v14  ;;  %v3639_v12 = vld [vmem:[%s5239_s1 + $0x68] ss:$24 sps:$4 sm:$0xff]   ;;  %v3644_v14 = vld [vmem:[%s5239_s1 + $0x7b4] ss:$24 sps:$4 sm:$0xff]  }
  0x44   :  { %2149 = vmatprep.subr.bf16.mxu0 %v3560_v18  ;;  %2174 = vmatprep.subr.bf16.mxu1 %v3563_v19  ;;  %v3653_v18 = vld [vmem:[%s5239_s1 + $0xc] ss:$24 sps:$4 sm:$0xff]  }
  0x45   :  { %2204 = vmatprep.mubr.bf16.mxu1 %v4286_v23  ;;  %v3650_v19 = vld [vmem:[%s5239_s1 + $0x784] ss:$24 sps:$4 sm:$0xff]  }
  0x47   :  { %2150 = vmatpush2.bf16.msra.mxu0 %v3558_v21  ;;  %2175 = vmatpush1.bf16.msra.mxu1 %v3561_v24  ;;  %v3651_v21 = vld [vmem:[%s5239_s1 + $0x8] ss:$24 sps:$4 sm:$0xff]   ;;  %v3657_v24 = vld [vmem:[%s5239_s1 + $0x2dc] ss:$24 sps:$4 sm:$0xff]  }
  0x48   :  { %2151 = vmatprep.subr.bf16.mxu0 %v3568_v25  ;;  %2176 = vmatprep.subr.bf16.mxu1 %v3571_v26  ;;  %v3660_v25 = vld [vmem:[%s5239_s1 + $0x45c] ss:$24 sps:$4 sm:$0xff]   ;;  %v3655_v26 = vld [vmem:[%s5239_s1 + $0x2d8] ss:$24 sps:$4 sm:$0xff]  }
  0x4b   :  { %2152 = vmatpush2.bf16.msra.mxu0 %v3566_v27  ;;  %2177 = vmatpush1.bf16.msra.mxu1 %v3569_v28  ;;  %v3658_v27 = vld [vmem:[%s5239_s1 + $0x458] ss:$24 sps:$4 sm:$0xff]   ;;  %v3663_v28 = vld [vmem:[%s5239_s1 + $0x2ac] ss:$24 sps:$4 sm:$0xff]  }
  0x4c   :  { %2153 = vmatprep.subr.bf16.mxu0 %v3574_v29  ;;  %2178 = vmatprep.subr.bf16.mxu1 %v3577_v30  ;;  %v3666_v29 = vld [vmem:[%s5239_s1 + $0x42c] ss:$24 sps:$4 sm:$0xff]   ;;  %v3661_v30 = vld [vmem:[%s5239_s1 + $0x2a8] ss:$24 sps:$4 sm:$0xff]  }
  0x4f   :  { %2154 = vmatpush2.bf16.msra.mxu0 %v3572_v31  ;;  %2179 = vmatpush1.bf16.msra.mxu1 %v3575_v32  ;;  %v3664_v31 = vld [vmem:[%s5239_s1 + $0x428] ss:$24 sps:$4 sm:$0xff]   ;;  %v3669_v32 = vld [vmem:[%s5239_s1 + $0x27c] ss:$24 sps:$4 sm:$0xff]  }
  0x50   :  { %2155 = vmatprep.subr.bf16.mxu0 %v3582_v33  ;;  %2180 = vmatprep.subr.bf16.mxu1 %v3585_v34  ;;  %v3672_v33 = vld [vmem:[%s5239_s1 + $0x3fc] ss:$24 sps:$4 sm:$0xff]   ;;  %v3667_v34 = vld [vmem:[%s5239_s1 + $0x278] ss:$24 sps:$4 sm:$0xff]  }
  0x53   :  { %2156 = vmatpush2.bf16.msra.mxu0 %v3580_v35  ;;  %2181 = vmatpush1.bf16.msra.mxu1 %v3583_v37  ;;  %v3670_v35 = vld [vmem:[%s5239_s1 + $0x3f8] ss:$24 sps:$4 sm:$0xff]   ;;  %v3675_v37 = vld [vmem:[%s5239_s1 + $0x24c] ss:$24 sps:$4 sm:$0xff]  }
  0x54   :  { %2157 = vmatprep.subr.bf16.mxu0 %v3588_v38  ;;  %2182 = vmatprep.subr.bf16.mxu1 %v3591_v39  ;;  %v3678_v38 = vld [vmem:[%s5239_s1 + $0x3cc] ss:$24 sps:$4 sm:$0xff]   ;;  %v3673_v39 = vld [vmem:[%s5239_s1 + $0x248] ss:$24 sps:$4 sm:$0xff]  }
  0x57   :  { %2158 = vmatpush2.bf16.msra.mxu0 %v3586_v40  ;;  %2183 = vmatpush1.bf16.msra.mxu1 %v3589_v41  ;;  %v3676_v40 = vld [vmem:[%s5239_s1 + $0x3c8] ss:$24 sps:$4 sm:$0xff]   ;;  %v3681_v41 = vld [vmem:[%s5239_s1 + $0x21c] ss:$24 sps:$4 sm:$0xff]  }
  0x58   :  { %2159 = vmatprep.subr.bf16.mxu0 %v3596_v42  ;;  %2184 = vmatprep.subr.bf16.mxu1 %v3599_v43  ;;  %v3684_v42 = vld [vmem:[%s5239_s1 + $0x39c] ss:$24 sps:$4 sm:$0xff]   ;;  %v3679_v43 = vld [vmem:[%s5239_s1 + $0x218] ss:$24 sps:$4 sm:$0xff]  }
  0x5b   :  { %2160 = vmatpush2.bf16.msra.mxu0 %v3594_v44  ;;  %2185 = vmatpush1.bf16.msra.mxu1 %v3597_v45  ;;  %v3682_v44 = vld [vmem:[%s5239_s1 + $0x398] ss:$24 sps:$4 sm:$0xff]   ;;  %v3687_v45 = vld [vmem:[%s5239_s1 + $0x1ec] ss:$24 sps:$4 sm:$0xff]  }
  0x5c   :  { %2161 = vmatprep.subr.bf16.mxu0 %v3602_v46  ;;  %2186 = vmatprep.subr.bf16.mxu1 %v3605_v47  ;;  %v3690_v46 = vld [vmem:[%s5239_s1 + $0x36c] ss:$24 sps:$4 sm:$0xff]   ;;  %v3685_v47 = vld [vmem:[%s5239_s1 + $0x1e8] ss:$24 sps:$4 sm:$0xff]  }
  0x5f   :  { %2162 = vmatpush2.bf16.msra.mxu0 %v3600_v48  ;;  %2187 = vmatpush1.bf16.msra.mxu1 %v3603_v49  ;;  %v3688_v48 = vld [vmem:[%s5239_s1 + $0x368] ss:$24 sps:$4 sm:$0xff]   ;;  %v3693_v49 = vld [vmem:[%s5239_s1 + $0x1bc] ss:$24 sps:$4 sm:$0xff]  }
  0x60   :  { %2213 = vmatprep.subr.bf16.mxu0 %v3611_v50  ;;  %2188 = vmatprep.subr.bf16.mxu1 %v3608_v51  ;;  %v3696_v50 = vld [vmem:[%s5239_s1 + $0x33c] ss:$24 sps:$4 sm:$0xff]   ;;  %v3691_v51 = vld [vmem:[%s5239_s1 + $0x1b8] ss:$24 sps:$4 sm:$0xff]  }
  0x62   :  { %2164 = vmatmul.mubr.bf16.vlgmr.msra.gmra.mxu0 %v4374_v52 }
  0x63   :  { %2214 = vmatpush1.bf16.msra.mxu0 %v3609_v54  ;;  %2245 = vmatprep.mubr.bf16.mxu0 %v4203_v59  ;;  %v3699_v54 = vld [vmem:[%s5239_s1 + $0x18c] ss:$24 sps:$4 sm:$0xff]  }
  0x64   :  { %2189 = vmatpush2.bf16.msra.mxu1 %v3606_v53  ;;  %2215 = vmatprep.subr.bf16.mxu0 %v3617_v55  ;;  %v3694_v53 = vld [vmem:[%s5239_s1 + $0x338] ss:$24 sps:$4 sm:$0xff]   ;;  %v3702_v55 = vld [vmem:[%s5239_s1 + $0x30c] ss:$24 sps:$4 sm:$0xff]  }
  0x65   :  { %2190 = vmatprep.subr.bf16.mxu1 %v3614_v56  ;;  %v3697_v56 = vld [vmem:[%s5239_s1 + $0x188] ss:$24 sps:$4 sm:$0xff]  }
  0x67   :  { %2216 = vmatpush1.bf16.msra.mxu0 %v3615_v58  ;;  %v3708_v58 = vld [vmem:[%s5239_s1 + $0x75c] ss:$24 sps:$4 sm:$0xff]  }
  0x68   :  { %2191 = vmatpush2.bf16.msra.mxu1 %v3612_v57  ;;  %2217 = vmatprep.subr.bf16.mxu0 %v3623_v61  ;;  %v3700_v57 = vld [vmem:[%s5239_s1 + $0x308] ss:$24 sps:$4 sm:$0xff]   ;;  %v3705_v61 = vld [vmem:[%s5239_s1 + $0x5dc] ss:$24 sps:$4 sm:$0xff]  }
  0x69   :  { %2192 = vmatprep.subr.bf16.mxu1 %v3620_v62  ;;  %v3703_v62 = vld [vmem:[%s5239_s1 + $0x5d8] ss:$24 sps:$4 sm:$0xff]  }
  0x6b   :  { %2218 = vmatpush1.bf16.msra.mxu0 %v3621_v0  ;;  %v3714_v0 = vld [vmem:[%s5239_s1 + $0x72c] ss:$24 sps:$4 sm:$0xff]  }
  0x6c   :  { %2193 = vmatpush2.bf16.msra.mxu1 %v3618_v63  ;;  %2219 = vmatprep.subr.bf16.mxu0 %v3629_v1  ;;  %v3706_v63 = vld [vmem:[%s5239_s1 + $0x758] ss:$24 sps:$4 sm:$0xff]   ;;  %v3711_v1 = vld [vmem:[%s5239_s1 + $0x5ac] ss:$24 sps:$4 sm:$0xff]  }
  0x6d   :  { %2194 = vmatprep.subr.bf16.mxu1 %v3626_v2  ;;  %v3709_v2 = vld [vmem:[%s5239_s1 + $0x5a8] ss:$24 sps:$4 sm:$0xff]  }
  0x6f   :  { %2220 = vmatpush1.bf16.msra.mxu0 %v3627_v4  ;;  %v3720_v4 = vld [vmem:[%s5239_s1 + $0x6fc] ss:$24 sps:$4 sm:$0xff]  }
  0x70   :  { %2195 = vmatpush2.bf16.msra.mxu1 %v3624_v3  ;;  %2221 = vmatprep.subr.bf16.mxu0 %v3635_v5  ;;  %v3712_v3 = vld [vmem:[%s5239_s1 + $0x728] ss:$24 sps:$4 sm:$0xff]   ;;  %v3717_v5 = vld [vmem:[%s5239_s1 + $0x57c] ss:$24 sps:$4 sm:$0xff]  }
  0x71   :  { %2196 = vmatprep.subr.bf16.mxu1 %v3632_v6  ;;  %v3715_v6 = vld [vmem:[%s5239_s1 + $0x578] ss:$24 sps:$4 sm:$0xff]  }
  0x73   :  { %2222 = vmatpush1.bf16.msra.mxu0 %v3633_v8  ;;  %v3726_v8 = vld [vmem:[%s5239_s1 + $0x6cc] ss:$24 sps:$4 sm:$0xff]  }
  0x74   :  { %2197 = vmatpush2.bf16.msra.mxu1 %v3630_v7  ;;  %2223 = vmatprep.subr.bf16.mxu0 %v3641_v9  ;;  %v3718_v7 = vld [vmem:[%s5239_s1 + $0x6f8] ss:$24 sps:$4 sm:$0xff]   ;;  %v3723_v9 = vld [vmem:[%s5239_s1 + $0x54c] ss:$24 sps:$4 sm:$0xff]  }
  0x75   :  { %2198 = vmatprep.subr.bf16.mxu1 %v3638_v10  ;;  %v3721_v10 = vld [vmem:[%s5239_s1 + $0x548] ss:$24 sps:$4 sm:$0xff]  }
  0x77   :  { %2224 = vmatpush1.bf16.msra.mxu0 %v3639_v12  ;;  %v3732_v12 = vld [vmem:[%s5239_s1 + $0x69c] ss:$24 sps:$4 sm:$0xff]  }
  0x78   :  { %2199 = vmatpush2.bf16.msra.mxu1 %v3636_v11  ;;  %2225 = vmatprep.subr.bf16.mxu0 %v3647_v13  ;;  %v3724_v11 = vld [vmem:[%s5239_s1 + $0x6c8] ss:$24 sps:$4 sm:$0xff]   ;;  %v3729_v13 = vld [vmem:[%s5239_s1 + $0x51c] ss:$24 sps:$4 sm:$0xff]  }
  0x79   :  { %2200 = vmatprep.subr.bf16.mxu1 %v3644_v14  ;;  %v3730_v14 = vld [vmem:[%s5239_s1 + $0x698] ss:$24 sps:$4 sm:$0xff]  }
  0x7b   :  { %2226 = vmatpush1.bf16.msra.mxu0 %v3645_v17  ;;  %v3738_v17 = vld [vmem:[%s5239_s1 + $0x66c] ss:$24 sps:$4 sm:$0xff]  }
  0x7c   :  { %2201 = vmatpush2.bf16.msra.mxu1 %v3642_v15  ;;  %2227 = vmatprep.subr.bf16.mxu0 %v3653_v18  ;;  %v3727_v15 = vld [vmem:[%s5239_s1 + $0x518] ss:$24 sps:$4 sm:$0xff]   ;;  %v3735_v18 = vld [vmem:[%s5239_s1 + $0x4ec] ss:$24 sps:$4 sm:$0xff]  }
  0x7d   :  { %2202 = vmatprep.subr.bf16.mxu1 %v3650_v19  ;;  %v3736_v19 = vld [vmem:[%s5239_s1 + $0x668] ss:$24 sps:$4 sm:$0xff]  }
  0x7f   :  { %2228 = vmatpush1.bf16.msra.mxu0 %v3651_v21  ;;  %v3744_v21 = vld [vmem:[%s5239_s1 + $0x63c] ss:$24 sps:$4 sm:$0xff]  }
  0x80   :  { %2203 = vmatpush2.bf16.msra.mxu1 %v3648_v20  ;;  %2229 = vmatprep.subr.bf16.mxu0 %v3657_v24  ;;  %v3733_v20 = vld [vmem:[%s5239_s1 + $0x4e8] ss:$24 sps:$4 sm:$0xff]   ;;  %v3741_v24 = vld [vmem:[%s5239_s1 + $0x4bc] ss:$24 sps:$4 sm:$0xff]  }
  0x81   :  { %2254 = vmatprep.subr.bf16.mxu1 %v3660_v25  ;;  %v3742_v25 = vld [vmem:[%s5239_s1 + $0x638] ss:$24 sps:$4 sm:$0xff]  }
  0x83   :  { %2205 = vmatmul.mubr.bf16.vlgmr.msra.gmra.mxu1 %v4206_v60  ;;  %2230 = vmatpush2.bf16.msra.mxu0 %v3655_v26  ;;  %v3739_v26 = vld [vmem:[%s5239_s1 + $0x4b8] ss:$24 sps:$4 sm:$0xff]  }
  0x84   :  { %2255 = vmatpush1.bf16.msra.mxu1 %v3658_v27  ;;  %2231 = vmatprep.subr.bf16.mxu0 %v3663_v28  ;;  %v3750_v27 = vld [vmem:[%s5239_s1 + $0x60c] ss:$24 sps:$4 sm:$0xff]  }
  0x85   :  { %2256 = vmatprep.subr.bf16.mxu1 %v3666_v29  ;;  %2286 = vmatprep.mubr.bf16.mxu1 %v4283_v22  ;;  %v3747_v28 = vld [vmem:[%s5239_s1 + $0x48c] ss:$24 sps:$4 sm:$0xff]   ;;  %v3748_v29 = vld [vmem:[%s5239_s1 + $0x608] ss:$24 sps:$4 sm:$0xff]  }
  0x87   :  { %2232 = vmatpush2.bf16.msra.mxu0 %v3661_v30  ;;  %v3745_v30 = vld [vmem:[%s5239_s1 + $0x488] ss:$24 sps:$4 sm:$0xff]  }
  0x88   :  { %2257 = vmatpush1.bf16.msra.mxu1 %v3664_v31  ;;  %2233 = vmatprep.subr.bf16.mxu0 %v3669_v32  ;;  %v3753_v31 = vld [vmem:[%s5239_s1 + $0x8dc] ss:$24 sps:$4 sm:$0xff]  }
  0x89   :  { %2258 = vmatprep.subr.bf16.mxu1 %v3672_v33  ;;  %v3756_v32 = vld [vmem:[%s5239_s1 + $0x164] ss:$24 sps:$4 sm:$0xff]   ;;  %v3751_v33 = vld [vmem:[%s5239_s1 + $0x8d8] ss:$24 sps:$4 sm:$0xff]  }
  0x8b   :  { %2234 = vmatpush2.bf16.msra.mxu0 %v3667_v34  ;;  %v3754_v34 = vld [vmem:[%s5239_s1 + $0x160] ss:$24 sps:$4 sm:$0xff]  }
  0x8c   :  { %2259 = vmatpush1.bf16.msra.mxu1 %v3670_v35  ;;  %2235 = vmatprep.subr.bf16.mxu0 %v3675_v37  ;;  %v3759_v35 = vld [vmem:[%s5239_s1 + $0x8ac] ss:$24 sps:$4 sm:$0xff]  }
  0x8d   :  { %2260 = vmatprep.subr.bf16.mxu1 %v3678_v38  ;;  %v3762_v37 = vld [vmem:[%s5239_s1 + $0x134] ss:$24 sps:$4 sm:$0xff]   ;;  %v3757_v38 = vld [vmem:[%s5239_s1 + $0x8a8] ss:$24 sps:$4 sm:$0xff]  }
  0x8f   :  { %2236 = vmatpush2.bf16.msra.mxu0 %v3673_v39  ;;  %v3760_v39 = vld [vmem:[%s5239_s1 + $0x130] ss:$24 sps:$4 sm:$0xff]  }
  0x90   :  { %2261 = vmatpush1.bf16.msra.mxu1 %v3676_v40  ;;  %2237 = vmatprep.subr.bf16.mxu0 %v3681_v41  ;;  %v3765_v40 = vld [vmem:[%s5239_s1 + $0x87c] ss:$24 sps:$4 sm:$0xff]  }
  0x91   :  { %2262 = vmatprep.subr.bf16.mxu1 %v3684_v42  ;;  %v3768_v41 = vld [vmem:[%s5239_s1 + $0x104] ss:$24 sps:$4 sm:$0xff]   ;;  %v3763_v42 = vld [vmem:[%s5239_s1 + $0x878] ss:$24 sps:$4 sm:$0xff]  }
  0x93   :  { %2238 = vmatpush2.bf16.msra.mxu0 %v3679_v43  ;;  %v3766_v43 = vld [vmem:[%s5239_s1 + $0x100] ss:$24 sps:$4 sm:$0xff]  }
  0x94   :  { %2263 = vmatpush1.bf16.msra.mxu1 %v3682_v44  ;;  %2239 = vmatprep.subr.bf16.mxu0 %v3687_v45  ;;  %v3771_v44 = vld [vmem:[%s5239_s1 + $0x84c] ss:$24 sps:$4 sm:$0xff]   ;;  %v3769_v45 = vld [vmem:[%s5239_s1 + $0x848] ss:$24 sps:$4 sm:$0xff]  }
  0x95   :  { %2264 = vmatprep.subr.bf16.mxu1 %v3690_v46  ;;  %v3772_v46 = vld [vmem:[%s5239_s1 + $0xd0] ss:$24 sps:$4 sm:$0xff]  }
  0x97   :  { %2240 = vmatpush2.bf16.msra.mxu0 %v3685_v47  ;;  %v3777_v47 = vld [vmem:[%s5239_s1 + $0x81c] ss:$24 sps:$4 sm:$0xff]  }
  0x98   :  { %2265 = vmatpush1.bf16.msra.mxu1 %v3688_v48  ;;  %2241 = vmatprep.subr.bf16.mxu0 %v3693_v49  ;;  %v3780_v48 = vld [vmem:[%s5239_s1 + $0xa4] ss:$24 sps:$4 sm:$0xff]   ;;  %v3775_v49 = vld [vmem:[%s5239_s1 + $0x818] ss:$24 sps:$4 sm:$0xff]  }
  0x99   :  { %2266 = vmatprep.subr.bf16.mxu1 %v3696_v50  ;;  %v3778_v50 = vld [vmem:[%s5239_s1 + $0xa0] ss:$24 sps:$4 sm:$0xff]  }
  0x9b   :  { %2242 = vmatpush2.bf16.msra.mxu0 %v3691_v51  ;;  %v3783_v51 = vld [vmem:[%s5239_s1 + $0x7ec] ss:$24 sps:$4 sm:$0xff]  }
  0x9c   :  { %2267 = vmatpush1.bf16.msra.mxu1 %v3694_v53  ;;  %2243 = vmatprep.subr.bf16.mxu0 %v3699_v54  ;;  %v3786_v53 = vld [vmem:[%s5239_s1 + $0x74] ss:$24 sps:$4 sm:$0xff]   ;;  %v3781_v54 = vld [vmem:[%s5239_s1 + $0x7e8] ss:$24 sps:$4 sm:$0xff]  }
  0x9d   :  { %2268 = vmatprep.subr.bf16.mxu1 %v3702_v55  ;;  %v3784_v55 = vld [vmem:[%s5239_s1 + $0x70] ss:$24 sps:$4 sm:$0xff]  }
  0x9f   :  { %2244 = vmatpush2.bf16.msra.mxu0 %v3697_v56  ;;  %v3789_v56 = vld [vmem:[%s5239_s1 + $0x7bc] ss:$24 sps:$4 sm:$0xff]  }
  0xa0   :  { %2269 = vmatpush1.bf16.msra.mxu1 %v3700_v57  ;;  %2295 = vmatprep.subr.bf16.mxu0 %v3708_v58  ;;  %v3792_v57 = vld [vmem:[%s5239_s1 + $0x44] ss:$24 sps:$4 sm:$0xff]   ;;  %v3787_v58 = vld [vmem:[%s5239_s1 + $0x7b8] ss:$24 sps:$4 sm:$0xff]  }
  0xa1   :  { %2270 = vmatprep.subr.bf16.mxu1 %v3705_v61  ;;  %v3790_v61 = vld [vmem:[%s5239_s1 + $0x40] ss:$24 sps:$4 sm:$0xff]  }
  0xa2   :  { %2246 = vmatmul.mubr.bf16.vlgmr.msra.gmra.mxu0 %v4264_v16 }
  0xa3   :  { %2296 = vmatpush1.bf16.msra.mxu0 %v3706_v63  ;;  %2327 = vmatprep.mubr.bf16.mxu0 %v4286_v23  ;;  %v3798_v63 = vld [vmem:[%s5239_s1 + $0x14] ss:$24 sps:$4 sm:$0xff]  }
  0xa4   :  { %2271 = vmatpush2.bf16.msra.mxu1 %v3703_v62  ;;  %2297 = vmatprep.subr.bf16.mxu0 %v3714_v0  ;;  %v3795_v62 = vld [vmem:[%s5239_s1 + $0x78c] ss:$24 sps:$4 sm:$0xff]   ;;  %v3793_v0 = vld [vmem:[%s5239_s1 + $0x788] ss:$24 sps:$4 sm:$0xff]  }
  0xa5   :  { %2272 = vmatprep.subr.bf16.mxu1 %v3711_v1  ;;  %v3796_v1 = vld [vmem:[%s5239_s1 + $0x10] ss:$24 sps:$4 sm:$0xff]  }
  0xa7   :  { %2298 = vmatpush1.bf16.msra.mxu0 %v3712_v3  ;;  %v3801_v3 = vld [vmem:[%s5239_s1 + $0x2e4] ss:$24 sps:$4 sm:$0xff]  }
  0xa8   :  { %2273 = vmatpush2.bf16.msra.mxu1 %v3709_v2  ;;  %2299 = vmatprep.subr.bf16.mxu0 %v3720_v4  ;;  %v3804_v2 = vld [vmem:[%s5239_s1 + $0x464] ss:$24 sps:$4 sm:$0xff]   ;;  %v3799_v4 = vld [vmem:[%s5239_s1 + $0x2e0] ss:$24 sps:$4 sm:$0xff]  }
  0xa9   :  { %2274 = vmatprep.subr.bf16.mxu1 %v3717_v5  ;;  %v3802_v5 = vld [vmem:[%s5239_s1 + $0x460] ss:$24 sps:$4 sm:$0xff]  }
  0xab   :  { %2300 = vmatpush1.bf16.msra.mxu0 %v3718_v7  ;;  %v3810_v7 = vld [vmem:[%s5239_s1 + $0x434] ss:$24 sps:$4 sm:$0xff]  }
  0xac   :  { %2275 = vmatpush2.bf16.msra.mxu1 %v3715_v6  ;;  %2301 = vmatprep.subr.bf16.mxu0 %v3726_v8  ;;  %v3807_v6 = vld [vmem:[%s5239_s1 + $0x2b4] ss:$24 sps:$4 sm:$0xff]   ;;  %v3808_v8 = vld [vmem:[%s5239_s1 + $0x430] ss:$24 sps:$4 sm:$0xff]  }
  0xad   :  { %2276 = vmatprep.subr.bf16.mxu1 %v3723_v9  ;;  %v3805_v9 = vld [vmem:[%s5239_s1 + $0x2b0] ss:$24 sps:$4 sm:$0xff]  }
  0xaf   :  { %2302 = vmatpush1.bf16.msra.mxu0 %v3724_v11  ;;  %v3813_v11 = vld [vmem:[%s5239_s1 + $0x284] ss:$24 sps:$4 sm:$0xff]  }
  0xb0   :  { %2277 = vmatpush2.bf16.msra.mxu1 %v3721_v10  ;;  %2303 = vmatprep.subr.bf16.mxu0 %v3732_v12  ;;  %v3816_v12 = vld [vmem:[%s5239_s1 + $0x404] ss:$24 sps:$4 sm:$0xff]  }
  0xb1   :  { %2278 = vmatprep.subr.bf16.mxu1 %v3729_v13 }
  0xb3   :  { %2304 = vmatpush1.bf16.msra.mxu0 %v3730_v14  ;;  %v3814_v14 = vld [vmem:[%s5239_s1 + $0x400] ss:$24 sps:$4 sm:$0xff]  }
  0xb4   :  { %2279 = vmatpush2.bf16.msra.mxu1 %v3727_v15  ;;  %2305 = vmatprep.subr.bf16.mxu0 %v3738_v17  ;;  %v3811_v15 = vld [vmem:[%s5239_s1 + $0x280] ss:$24 sps:$4 sm:$0xff]  }
  0xb5   :  { %2280 = vmatprep.subr.bf16.mxu1 %v3735_v18  ;;  %v3819_v18 = vld [vmem:[%s5239_s1 + $0x254] ss:$24 sps:$4 sm:$0xff]  }
  0xb7   :  { %2306 = vmatpush1.bf16.msra.mxu0 %v3736_v19 }
  0xb8   :  { %2281 = vmatpush2.bf16.msra.mxu1 %v3733_v20  ;;  %2307 = vmatprep.subr.bf16.mxu0 %v3744_v21  ;;  %v3820_v20 = vld [vmem:[%s5239_s1 + $0x3d0] ss:$24 sps:$4 sm:$0xff]  }
  0xb9   :  { %2282 = vmatprep.subr.bf16.mxu1 %v3741_v24  ;;  %v3817_v21 = vld [vmem:[%s5239_s1 + $0x250] ss:$24 sps:$4 sm:$0xff]   ;;  %v3828_v24 = vld [vmem:[%s5239_s1 + $0x3a4] ss:$24 sps:$4 sm:$0xff]  }
  0xbb   :  { %2308 = vmatpush1.bf16.msra.mxu0 %v3742_v25  ;;  %v3825_v25 = vld [vmem:[%s5239_s1 + $0x224] ss:$24 sps:$4 sm:$0xff]  }
  0xbc   :  { %2283 = vmatpush2.bf16.msra.mxu1 %v3739_v26  ;;  %2309 = vmatprep.subr.bf16.mxu0 %v3750_v27  ;;  %v3826_v26 = vld [vmem:[%s5239_s1 + $0x3a0] ss:$24 sps:$4 sm:$0xff]  }
  0xbd   :  { %2284 = vmatprep.subr.bf16.mxu1 %v3747_v28  ;;  %v3823_v27 = vld [vmem:[%s5239_s1 + $0x220] ss:$24 sps:$4 sm:$0xff]   ;;  %v3834_v28 = vld [vmem:[%s5239_s1 + $0x374] ss:$24 sps:$4 sm:$0xff]  }
  0xbf   :  { %2310 = vmatpush1.bf16.msra.mxu0 %v3748_v29  ;;  %v3831_v29 = vld [vmem:[%s5239_s1 + $0x1f4] ss:$24 sps:$4 sm:$0xff]  }
  0xc0   :  { %2285 = vmatpush2.bf16.msra.mxu1 %v3745_v30  ;;  %2311 = vmatprep.subr.bf16.mxu0 %v3753_v31  ;;  %v3832_v30 = vld [vmem:[%s5239_s1 + $0x370] ss:$24 sps:$4 sm:$0xff]  }
  0xc1   :  { %2336 = vmatprep.subr.bf16.mxu1 %v3756_v32  ;;  %v3829_v31 = vld [vmem:[%s5239_s1 + $0x1f0] ss:$24 sps:$4 sm:$0xff]   ;;  %v3840_v32 = vld [vmem:[%s5239_s1 + $0x344] ss:$24 sps:$4 sm:$0xff]  }
  0xc3   :  { %2287 = vmatmul.mubr.bf16.vlgmr.msra.gmra.mxu1 %v4374_v52  ;;  %2312 = vmatpush2.bf16.msra.mxu0 %v3751_v33  ;;  %v3837_v33 = vld [vmem:[%s5239_s1 + $0x1c4] ss:$24 sps:$4 sm:$0xff]  }
  0xc4   :  { %2337 = vmatpush1.bf16.msra.mxu1 %v3754_v34  ;;  %2313 = vmatprep.subr.bf16.mxu0 %v3759_v35 }
  0xc5   :  { %2338 = vmatprep.subr.bf16.mxu1 %v3762_v37  ;;  %2368 = vmatprep.mubr.bf16.mxu1 %v4203_v59  ;;  %v3774_v59 = vld [vmem:[%s5239_s1 + $0xd4] ss:$24 sps:$4 sm:$0xff]  }
  0xc7   :  { %2314 = vmatpush2.bf16.msra.mxu0 %v3757_v38 }
  0xc8   :  { %2339 = vmatpush1.bf16.msra.mxu1 %v3760_v39  ;;  %2315 = vmatprep.subr.bf16.mxu0 %v3765_v40 }
  0xc9   :  { %2340 = vmatprep.subr.bf16.mxu1 %v3768_v41 }
  0xcb   :  { %2316 = vmatpush2.bf16.msra.mxu0 %v3763_v42 }
  0xcc   :  { %2341 = vmatpush1.bf16.msra.mxu1 %v3766_v43  ;;  %2317 = vmatprep.subr.bf16.mxu0 %v3771_v44 }
  0xcd   :  { %2342 = vmatprep.subr.bf16.mxu1 %v3774_v59 }
  0xcf   :  { %2318 = vmatpush2.bf16.msra.mxu0 %v3769_v45 }
  0xd0   :  { %2343 = vmatpush1.bf16.msra.mxu1 %v3772_v46  ;;  %2319 = vmatprep.subr.bf16.mxu0 %v3777_v47 }
  0xd1   :  { %2344 = vmatprep.subr.bf16.mxu1 %v3780_v48 }
  0xd3   :  { %2320 = vmatpush2.bf16.msra.mxu0 %v3775_v49 }
  0xd4   :  { %2345 = vmatpush1.bf16.msra.mxu1 %v3778_v50  ;;  %2321 = vmatprep.subr.bf16.mxu0 %v3783_v51 }
  0xd5   :  { %2346 = vmatprep.subr.bf16.mxu1 %v3786_v53 }
  0xd7   :  { %2322 = vmatpush2.bf16.msra.mxu0 %v3781_v54 }
  0xd8   :  { %2347 = vmatpush1.bf16.msra.mxu1 %v3784_v55  ;;  %2323 = vmatprep.subr.bf16.mxu0 %v3789_v56 }
  0xd9   :  { %2348 = vmatprep.subr.bf16.mxu1 %v3792_v57 }
  0xdb   :  { %2324 = vmatpush2.bf16.msra.mxu0 %v3787_v58 }
  0xdc   :  { %2349 = vmatpush1.bf16.msra.mxu1 %v3790_v61  ;;  %2325 = vmatprep.subr.bf16.mxu0 %v3795_v62 }
  0xdd   :  { %2350 = vmatprep.subr.bf16.mxu1 %v3798_v63 }
  0xdf   :  { %2326 = vmatpush2.bf16.msra.mxu0 %v3793_v0 }
  0xe0   :  { %2351 = vmatpush1.bf16.msra.mxu1 %v3796_v1  ;;  %2377 = vmatprep.subr.bf16.mxu0 %v3804_v2 }
  0xe1   :  { %2352 = vmatprep.subr.bf16.mxu1 %v3801_v3 }
  0xe2   :  { %2328 = vmatmul.mubr.bf16.vlgmr.msra.gmra.mxu0 %v4206_v60  ;;  %v3454_v10 = vpop.f32.mrf.mxu0 }
  0xe3   :  { %2378 = vmatpush1.bf16.msra.mxu0 %v3802_v5  ;;  %257 = vst [vmem:[%s5246_s8 + $0x10] sm:$0xff] %v3454_v10  ;;  %2409 = vmatprep.mubr.bf16.mxu0 %v4283_v22  ;;  %v3822_v22 = vld [vmem:[%s5239_s1 + $0x3d4] ss:$24 sps:$4 sm:$0xff]  }
  0xe4   :  { %2353 = vmatpush2.bf16.msra.mxu1 %v3799_v4  ;;  %2379 = vmatprep.subr.bf16.mxu0 %v3810_v7  ;;  %v192_v13 = vpop.f32.mrf.mxu0 }
  0xe5   :  { %2354 = vmatprep.subr.bf16.mxu1 %v3807_v6  ;;  %255 = vst [vmem:[%s5246_s8] sm:$0xff] %v192_v13 }
  0xe6   :  { %v3455_v17 = vpop.f32.mrf.mxu0 }
  0xe7   :  { %2380 = vmatpush1.bf16.msra.mxu0 %v3808_v8  ;;  %258 = vst [vmem:[%s5246_s8 + $0x18] sm:$0xff] %v3455_v17 }
  0xe8   :  { %2355 = vmatpush2.bf16.msra.mxu1 %v3805_v9  ;;  %2381 = vmatprep.subr.bf16.mxu0 %v3816_v12  ;;  %v195_v19 = vpop.f32.mrf.mxu0 }
  0xe9   :  { %2356 = vmatprep.subr.bf16.mxu1 %v3813_v11  ;;  %256 = vst [vmem:[%s5246_s8 + $0x8] sm:$0xff] %v195_v19 }
  0xea   :  { %v3458_v34 = vpop.f32.mrf.mxu0 }
  0xeb   :  { %2382 = vmatpush1.bf16.msra.mxu0 %v3814_v14  ;;  %261 = vst [vmem:[%s5246_s8 + $0x30] sm:$0xff] %v3458_v34 }
  0xec   :  { %2357 = vmatpush2.bf16.msra.mxu1 %v3811_v15  ;;  %2383 = vmatprep.subr.bf16.mxu0 %v3822_v22 }
  0xed   :  { %2358 = vmatprep.subr.bf16.mxu1 %v3819_v18 }
  0xef   :  { %2384 = vmatpush1.bf16.msra.mxu0 %v3820_v20 }
  0xf0   :  { %2359 = vmatpush2.bf16.msra.mxu1 %v3817_v21  ;;  %2385 = vmatprep.subr.bf16.mxu0 %v3828_v24 }
  0xf1   :  { %2360 = vmatprep.subr.bf16.mxu1 %v3825_v25 }
  0xf3   :  { %2386 = vmatpush1.bf16.msra.mxu0 %v3826_v26 }
  0xf4   :  { %2361 = vmatpush2.bf16.msra.mxu1 %v3823_v27  ;;  %2387 = vmatprep.subr.bf16.mxu0 %v3834_v28 }
  0xf5   :  { %2362 = vmatprep.subr.bf16.mxu1 %v3831_v29 }
  0xf6   :  { %14 = vsyncpa [#allocation3], 0  ;;  %v3838_v35 = vld [vmem:[%s5239_s1 + $0x340] ss:$24 sps:$4 sm:$0xff]   ;;  %v208_v37 = vpop.f32.mrf.mxu0  ;;  %v3846_v39 = vld [vmem:[%s5239_s1 + $0x314] ss:$24 sps:$4 sm:$0xff]  }
  0xf7   :  { %2388 = vmatpush1.bf16.msra.mxu0 %v3832_v30  ;;  %v3835_v38 = vld [vmem:[%s5239_s1 + $0x1c0] ss:$24 sps:$4 sm:$0xff]   ;;  %259 = vst [vmem:[%s5246_s8 + $0x20] sm:$0xff] %v208_v37  ;;  %v3843_v40 = vld [vmem:[%s5239_s1 + $0x194] ss:$24 sps:$4 sm:$0xff]   ;;  %s4002_s18 = smov [#allocation2]  }
  0xf8   :  { %2363 = vmatpush2.bf16.msra.mxu1 %v3829_v31  ;;  %2389 = vmatprep.subr.bf16.mxu0 %v3840_v32  ;;  %v3459_v41 = vpop.f32.mrf.mxu0  ;;  %v3844_v42 = vld [vmem:[%s5239_s1 + $0x310] ss:$24 sps:$4 sm:$0xff]   ;;  %v3849_v59 = vld [vmem:[%s5239_s1 + $0x5e4] ss:$24 sps:$4 sm:$0xff]   ;;  %v3847_v47 = vld [vmem:[%s5239_s1 + $0x5e0] ss:$24 sps:$4 sm:$0xff]  }
  0xf9   :  { %2364 = vmatprep.subr.bf16.mxu1 %v3837_v33  ;;  %262 = vst [vmem:[%s5246_s8 + $0x38] sm:$0xff] %v3459_v41  ;;  %v3841_v44 = vld [vmem:[%s5239_s1 + $0x190] ss:$24 sps:$4 sm:$0xff]   ;;  %v3852_v45 = vld [vmem:[%s5239_s1 + $0x764] ss:$24 sps:$4 sm:$0xff]   ;;  %s2989_s19 = sshll.u32 %s4002_s18, 4  ;;  %s2990_s19 = int_to_ptr.vmem [resolvable:$true] %s2989_s19 }
  0xfa   :  { %v211_v43 = vpop.f32.mrf.mxu0  ;;  %v3850_v49 = vld [vmem:[%s5239_s1 + $0x760] ss:$24 sps:$4 sm:$0xff]   ;;  %v3855_v50 = vld [vmem:[%s5239_s1 + $0x5b4] ss:$24 sps:$4 sm:$0xff]   ;;  %v3853_v55 = vld [vmem:[%s5239_s1 + $0x5b0] ss:$24 sps:$4 sm:$0xff]   ;;  %p3984_p1 = scmp.lt.s32.totalorder %s2990_s19, %s2990_s19 }
  0xfb   :  { %2390 = vmatpush1.bf16.msra.mxu0 %v3838_v35  ;;  %260 = vst [vmem:[%s5246_s8 + $0x28] sm:$0xff] %v211_v43  ;;  %v3858_v51 = vld [vmem:[%s5239_s1 + $0x734] ss:$24 sps:$4 sm:$0xff]   ;;  %v3856_v57 = vld [vmem:[%s5239_s1 + $0x730] ss:$24 sps:$4 sm:$0xff]   ;;  %v3913_v27 = vld [vmem:[%s5241_s3 + $0x78] sm:$0xff]  }
  0xfc   :  { %2365 = vmatpush2.bf16.msra.mxu1 %v3835_v38  ;;  %2391 = vmatprep.subr.bf16.mxu0 %v3846_v39  ;;  %v3462_v46 = vpop.f32.mrf.mxu0  ;;  %v3861_v58 = vld [vmem:[%s5239_s1 + $0x584] ss:$24 sps:$4 sm:$0xff]   ;;  %v3859_v0 = vld [vmem:[%s5239_s1 + $0x580] ss:$24 sps:$4 sm:$0xff]   ;;  %v3870_v4 = vld [vmem:[%s5239_s1 + $0x6d4] ss:$24 sps:$4 sm:$0xff]  }
  0xfd   :  { %2366 = vmatprep.subr.bf16.mxu1 %v3843_v40  ;;  %265 = vst [vmem:[%s5246_s8 + $0x50] sm:$0xff] %v3462_v46  ;;  %v3864_v61 = vld [vmem:[%s5239_s1 + $0x704] ss:$24 sps:$4 sm:$0xff]   ;;  %v3862_v2 = vld [vmem:[%s5239_s1 + $0x700] ss:$24 sps:$4 sm:$0xff]   ;;  %v3918_v31 = vld [vmem:[%s5241_s3 + $0x70] sm:$0xff]  }
  0xfe   :  { %v224_v48 = vpop.f32.mrf.mxu0  ;;  %v3865_v6 = vld [vmem:[%s5239_s1 + $0x550] ss:$24 sps:$4 sm:$0xff]   ;;  %v3873_v9 = vld [vmem:[%s5239_s1 + $0x524] ss:$24 sps:$4 sm:$0xff]   ;;  %v3871_v11 = vld [vmem:[%s5239_s1 + $0x520] ss:$24 sps:$4 sm:$0xff]  }
  0xff   :  { %2392 = vmatpush1.bf16.msra.mxu0 %v3844_v42  ;;  %263 = vst [vmem:[%s5246_s8 + $0x40] sm:$0xff] %v224_v48  ;;  %v3868_v8 = vld [vmem:[%s5239_s1 + $0x6d0] ss:$24 sps:$4 sm:$0xff]   ;;  %v3876_v10 = vld [vmem:[%s5239_s1 + $0x6a4] ss:$24 sps:$4 sm:$0xff]   ;;  %s3979_s20 = scalar_lea.vmem %s2990_s19, 32 }
 0x100   :  { %2367 = vmatpush2.bf16.msra.mxu1 %v3841_v44  ;;  %2393 = vmatprep.subr.bf16.mxu0 %v3849_v59  ;;  %v3463_v53 = vpop.f32.mrf.mxu0  ;;  %v3874_v12 = vld [vmem:[%s5239_s1 + $0x6a0] ss:$24 sps:$4 sm:$0xff]   ;;  %v3879_v13 = vld [vmem:[%s5239_s1 + $0x4f4] ss:$24 sps:$4 sm:$0xff]   ;;  %v3877_v15 = vld [vmem:[%s5239_s1 + $0x4f0] ss:$24 sps:$4 sm:$0xff]   ;;  %p3980_p0 = scmp.ne.s32.totalorder %s2990_s19, %s3979_s20  ;;  %p3985_p2 = scmp.lt.s32.totalorder %s3979_s20, %s3979_s20 }
 0x101   :  { %2418 = vmatprep.subr.bf16.mxu1 %v3852_v45  ;;  %266 = vst [vmem:[%s5246_s8 + $0x58] sm:$0xff] %v3463_v53  ;;  %v3882_v14 = vld [vmem:[%s5239_s1 + $0x674] ss:$24 sps:$4 sm:$0xff]   ;;  %v3880_v22 = vld [vmem:[%s5239_s1 + $0x670] ss:$24 sps:$4 sm:$0xff]   ;;  %v3914_v29 = vld [vmem:[%s5241_s3 + $0x38] sm:$0xff]  }
 0x102   :  { %v4911_v54 = vpop.f32.mrf.mxu1  ;;  %v227_v56 = vpop.f32.mrf.mxu0  ;;  %v3885_v17 = vld [vmem:[%s5239_s1 + $0x4c4] ss:$24 sps:$4 sm:$0xff]   ;;  %v3883_v19 = vld [vmem:[%s5239_s1 + $0x4c0] ss:$24 sps:$4 sm:$0xff]   ;;  %v3891_v21 = vld [vmem:[%s5239_s1 + $0x494] ss:$24 sps:$4 sm:$0xff]   ;;  %p3986_p3 = por %p3985_p2, %p3984_p1 }
 0x103   :  { %2369 = vmatmul.mubr.bf16.vlgmr.msra.gmra.mxu1 %v4264_v16  ;;  %2394 = vmatpush2.bf16.msra.mxu0 %v3847_v47  ;;  %264 = vst [vmem:[%s5246_s8 + $0x48] sm:$0xff] %v227_v56  ;;  %v3888_v18 = vld [vmem:[%s5239_s1 + $0x644] ss:$24 sps:$4 sm:$0xff]   ;;  %v3886_v20 = vld [vmem:[%s5239_s1 + $0x640] ss:$24 sps:$4 sm:$0xff]   ;;  %v3919_v34 = vld [vmem:[%s5241_s3 + $0x30] sm:$0xff]  }
 0x104   :  { %2419 = vmatpush1.bf16.msra.mxu1 %v3850_v49  ;;  %2395 = vmatprep.subr.bf16.mxu0 %v3855_v50  ;;  %v4926_v16 = vpop.f32.mrf.mxu1  ;;  %v3466_v62 = vpop.f32.mrf.mxu0  ;;  %v3894_v24 = vld [vmem:[%s5239_s1 + $0x614] ss:$24 sps:$4 sm:$0xff]   ;;  %v3889_v25 = vld [vmem:[%s5239_s1 + $0x490] ss:$24 sps:$4 sm:$0xff]   ;;  %v3897_v28 = vld [vmem:[%s5239_s1 + $0x8e4] ss:$24 sps:$4 sm:$0xff]   ;;  %p3987_p4 = pnand %p3986_p3, %p3980_p0 }
 0x105   :  { %2420 = vmatprep.subr.bf16.mxu1 %v3858_v51  ;;  %2450 = vmatprep.mubr.bf16.mxu1 %v4286_v23  ;;  %269 = vst [vmem:[%s5246_s8 + $0x70] sm:$0xff] %v3466_v62  ;;  %v3867_v23 = vld [vmem:[%s5239_s1 + $0x554] ss:$24 sps:$4 sm:$0xff]   ;;  %v3892_v26 = vld [vmem:[%s5239_s1 + $0x610] ss:$24 sps:$4 sm:$0xff]   ;;  %v3925_v43 = vld [vmem:[%s5241_s3 + $0x60] sm:$0xff]  }
 0x106   :  { %v2128_v63 = vpop.f32.mrf.mxu1  ;;  %v240_v1 = vpop.f32.mrf.mxu0  ;;  %v3895_v30 = vld [vmem:[%s5239_s1 + $0x8e0] ss:$24 sps:$4 sm:$0xff]   ;;  %v3900_v32 = vld [vmem:[%s5239_s1 + $0x8b4] ss:$24 sps:$4 sm:$0xff]   ;;  %v3898_v37 = vld [vmem:[%s5239_s1 + $0x8b0] ss:$24 sps:$4 sm:$0xff]  }
 0x107   :  { %2396 = vmatpush2.bf16.msra.mxu0 %v3853_v55  ;;  %267 = vst [vmem:[%s5246_s8 + $0x60] sm:$0xff] %v240_v1  ;;  %v3923_v38 = vld [vmem:[%s5241_s3 + $0x68] sm:$0xff]   ;;  %v3901_v41 = vld [vmem:[%s5239_s1 + $0x880] ss:$24 sps:$4 sm:$0xff]   ;;  %v3909_v47 = vld [vmem:[%s5239_s1 + $0x824] ss:$24 sps:$4 sm:$0xff]  }
 0x108   :  { %2421 = vmatpush1.bf16.msra.mxu1 %v3856_v57  ;;  %2397 = vmatprep.subr.bf16.mxu0 %v3861_v58  ;;  %v2129_v3 = vpop.f32.mrf.mxu1  ;;  %v3467_v5 = vpop.f32.mrf.mxu0  ;;  %v3924_v40 = vld [vmem:[%s5241_s3 + $0x28] sm:$0xff]   ;;  %v3926_v59 = vld [vmem:[%s5241_s3 + $0x20] sm:$0xff]   ;;  %v3927_v46 = vld [vmem:[%s5241_s3 + $0x58] sm:$0xff]  }
 0x109   :  { %2422 = vmatprep.subr.bf16.mxu1 %v3864_v61  ;;  %270 = vst [vmem:[%s5246_s8 + $0x78] sm:$0xff] %v3467_v5  ;;  %v3906_v44 = vld [vmem:[%s5239_s1 + $0x854] ss:$24 sps:$4 sm:$0xff]   ;;  %v3904_v45 = vld [vmem:[%s5239_s1 + $0x850] ss:$24 sps:$4 sm:$0xff]   ;;  %v3928_v48 = vld [vmem:[%s5241_s3 + $0x18] sm:$0xff]  }
 0x10a   :  { %v243_v7 = vpop.f32.mrf.mxu0  ;;  %v3907_v49 = vld [vmem:[%s5239_s1 + $0x820] ss:$24 sps:$4 sm:$0xff]   ;;  %v3929_v50 = vld [vmem:[%s5241_s3 + $0x50] sm:$0xff]   ;;  %v3931_v56 = vld [vmem:[%s5241_s3 + $0x48] sm:$0xff]   ;;  %v568_v61 = vsub.s32 0, %v4147_v36 }
 0x10b   :  { %2398 = vmatpush2.bf16.msra.mxu0 %v3859_v0  ;;  %268 = vst [vmem:[%s5246_s8 + $0x68] sm:$0xff] %v243_v7  ;;  %v3912_v51 = vld [vmem:[%s5239_s1 + $0x7f4] ss:$24 sps:$4 sm:$0xff]   ;;  %v3910_v55 = vld [vmem:[%s5239_s1 + $0x7f0] ss:$24 sps:$4 sm:$0xff]   ;;  %v3933_v63 = vld [vmem:[%s5241_s3 + $0x40] sm:$0xff]  }
 0x10c   :  { %2423 = vmatpush1.bf16.msra.mxu1 %v3862_v2  ;;  %2399 = vmatprep.subr.bf16.mxu0 %v3867_v23  ;;  %v3930_v53 = vld [vmem:[%s5241_s3 + $0x10] sm:$0xff]   ;;  %v3917_v57 = vld [vmem:[%s5239_s1 + $0x7c4] ss:$24 sps:$4 sm:$0xff]   ;;  %v3932_v58 = vld [vmem:[%s5241_s3 + $0x8] sm:$0xff]   ;;  %v572_v2 = vsub.s32 1, %v4147_v36 }
 0x10d   :  { %2424 = vmatprep.subr.bf16.mxu1 %v3870_v4  ;;  %v3915_v62 = vld [vmem:[%s5239_s1 + $0x7c0] ss:$24 sps:$4 sm:$0xff]   ;;  %v3922_v1 = vld [vmem:[%s5239_s1 + $0x794] ss:$24 sps:$4 sm:$0xff]   ;;  %v3920_v4 = vld [vmem:[%s5239_s1 + $0x790] ss:$24 sps:$4 sm:$0xff]  }
 0x10e   :  { %v5106_v0 = vld [vmem:[%s5240_s2] sm:$0x3f]  ;;  %v3935_v5 = vld [vmem:[%s5241_s3 + $0xf8] sm:$0xff]  }
 0x10f   :  { %2400 = vmatpush2.bf16.msra.mxu0 %v3865_v6  ;;  %v3934_v23 = vld [vmem:[%s5241_s3] sm:$0xff]   ;;  %v569_v3 = vrot.slane %v5106_v0, %v568_v61  ;;  %v573_v6 = vrot.slane %v5106_v0, %v572_v2 }
 0x110   :  { %2425 = vmatpush1.bf16.msra.mxu1 %v3868_v8  ;;  %2401 = vmatprep.subr.bf16.mxu0 %v3873_v9  ;;  %v3966_v61 = vld [vmem:[%s5241_s3 + $0x100] sm:$0xff]  }
 0x111   :  { %2426 = vmatprep.subr.bf16.mxu1 %v3876_v10  ;;  %v2125_v7 = vadd.f32 %v4911_v54, %v569_v3  ;;  %v2127_v8 = vadd.f32 %v4926_v16, %v573_v6  ;;  %v3936_v16 = vld [vmem:[%s5241_s3 + $0xb8] sm:$0xff]  }
 0x113   :  { %2402 = vmatpush2.bf16.msra.mxu0 %v3871_v11 }
 0x114   :  { %2427 = vmatpush1.bf16.msra.mxu1 %v3874_v12  ;;  %2403 = vmatprep.subr.bf16.mxu0 %v3879_v13 }
 0x115   :  { %2428 = vmatprep.subr.bf16.mxu1 %v3882_v14 }
 0x117   :  { %2404 = vmatpush2.bf16.msra.mxu0 %v3877_v15 }
 0x118   :  { %2429 = vmatpush1.bf16.msra.mxu1 %v3880_v22  ;;  %2405 = vmatprep.subr.bf16.mxu0 %v3885_v17 }
 0x119   :  { %2430 = vmatprep.subr.bf16.mxu1 %v3888_v18 }
 0x11b   :  { %2406 = vmatpush2.bf16.msra.mxu0 %v3883_v19 }
 0x11c   :  { %2431 = vmatpush1.bf16.msra.mxu1 %v3886_v20  ;;  %2407 = vmatprep.subr.bf16.mxu0 %v3891_v21  ;;  %v3938_v20 = vld [vmem:[%s5241_s3 + $0xb0] sm:$0xff]   ;;  %v3939_v21 = vld [vmem:[%s5241_s3 + $0xe8] sm:$0xff]  }
 0x11d   :  { %2432 = vmatprep.subr.bf16.mxu1 %v3894_v24  ;;  %v3940_v24 = vld [vmem:[%s5241_s3 + $0xa8] sm:$0xff]  }
 0x11f   :  { %2408 = vmatpush2.bf16.msra.mxu0 %v3889_v25  ;;  %v3941_v25 = vld [vmem:[%s5241_s3 + $0xe0] sm:$0xff]  }
 0x120   :  { %2433 = vmatpush1.bf16.msra.mxu1 %v3892_v26  ;;  %3370 = vmatprep.subr.bf16.mxu0 %v3913_v27  ;;  %v3942_v27 = vld [vmem:[%s5241_s3 + $0xa0] sm:$0xff]  }
 0x121   :  { %2434 = vmatprep.subr.bf16.mxu1 %v3897_v28  ;;  %v3943_v28 = vld [vmem:[%s5241_s3 + $0xd8] sm:$0xff]  }
 0x122   :  { %v5028_v33 = vpop.f32.mrf.mxu0  ;;  %2410 = vmatmul.mubr.bf16.vlgmr.msra.gmra.mxu0 %v4374_v52  ;;  %v3903_v52 = vld [vmem:[%s5239_s1 + $0x884] ss:$24 sps:$4 sm:$0xff]  }
 0x123   :  { %3371 = vmatpush3.bf16.msra.mxu0 %v3914_v29  ;;  %v2166_v9 = vadd.f32 %v5028_v33, %v2125_v7 }
 0x124   :  { %2435 = vmatpush2.bf16.msra.mxu1 %v3895_v30  ;;  %v5034_v35 = vpop.f32.mrf.mxu0  ;;  %3372 = vmatprep.subr.bf16.mxu0 %v3918_v31  ;;  %v3951_v30 = vld [vmem:[%s5241_s3 + $0x178] sm:$0xff]  }
 0x125   :  { %2436 = vmatprep.subr.bf16.mxu1 %v3900_v32  ;;  %v2168_v11 = vadd.f32 %v5034_v35, %v2127_v8  ;;  %v3952_v31 = vld [vmem:[%s5241_s3 + $0x138] sm:$0xff]   ;;  %v3953_v32 = vld [vmem:[%s5241_s3 + $0x170] sm:$0xff]  }
 0x126   :  { %v2169_v39 = vpop.f32.mrf.mxu0  ;;  %v3945_v35 = vld [vmem:[%s5241_s3 + $0xd0] sm:$0xff]  }
 0x127   :  { %3373 = vmatpush3.bf16.msra.mxu0 %v3919_v34  ;;  %v3944_v34 = vld [vmem:[%s5241_s3 + $0x98] sm:$0xff]   ;;  %v3946_v39 = vld [vmem:[%s5241_s3 + $0x90] sm:$0xff]  }
 0x128   :  { %2437 = vmatpush2.bf16.msra.mxu1 %v3898_v37  ;;  %3374 = vmatprep.subr.bf16.mxu0 %v3923_v38  ;;  %v2170_v42 = vpop.f32.mrf.mxu0  ;;  %v3954_v38 = vld [vmem:[%s5241_s3 + $0x130] sm:$0xff]  }
 0x129   :  { %2438 = vmatprep.subr.bf16.mxu1 %v3903_v52  ;;  %v3955_v52 = vld [vmem:[%s5241_s3 + $0x168] sm:$0xff]  }
 0x12a   :  { %v3948_v42 = vld [vmem:[%s5241_s3 + $0x88] sm:$0xff]  }
 0x12b   :  { %3375 = vmatpush3.bf16.msra.mxu0 %v3924_v40  ;;  %v3947_v40 = vld [vmem:[%s5241_s3 + $0xc8] sm:$0xff]  }
 0x12c   :  { %2439 = vmatpush2.bf16.msra.mxu1 %v3901_v41  ;;  %3376 = vmatprep.subr.bf16.mxu0 %v3925_v43  ;;  %v3956_v41 = vld [vmem:[%s5241_s3 + $0x128] sm:$0xff]   ;;  %v3949_v43 = vld [vmem:[%s5241_s3 + $0xc0] sm:$0xff]  }
 0x12d   :  { %2440 = vmatprep.subr.bf16.mxu1 %v3906_v44  ;;  %v3950_v44 = vld [vmem:[%s5241_s3 + $0x80] sm:$0xff]  }
 0x12f   :  { %3377 = vmatpush3.bf16.msra.mxu0 %v3926_v59 }
 0x130   :  { %2441 = vmatpush2.bf16.msra.mxu1 %v3904_v45  ;;  %3378 = vmatprep.subr.bf16.mxu0 %v3927_v46  ;;  %v3957_v45 = vld [vmem:[%s5241_s3 + $0x160] sm:$0xff]  }
 0x131   :  { %2442 = vmatprep.subr.bf16.mxu1 %v3909_v47  ;;  %v3958_v46 = vld [vmem:[%s5241_s3 + $0x120] sm:$0xff]  }
 0x133   :  { %3379 = vmatpush3.bf16.msra.mxu0 %v3928_v48 }
 0x134   :  { %2443 = vmatpush2.bf16.msra.mxu1 %v3907_v49  ;;  %3380 = vmatprep.subr.bf16.mxu0 %v3929_v50  ;;  %v3959_v49 = vld [vmem:[%s5241_s3 + $0x158] sm:$0xff]  }
 0x135   :  { %2444 = vmatprep.subr.bf16.mxu1 %v3912_v51  ;;  %v3960_v50 = vld [vmem:[%s5241_s3 + $0x118] sm:$0xff]  }
 0x137   :  { %3381 = vmatpush3.bf16.msra.mxu0 %v3930_v53  ;;  %v3961_v53 = vld [vmem:[%s5241_s3 + $0x150] sm:$0xff]  }
 0x138   :  { %2445 = vmatpush2.bf16.msra.mxu1 %v3910_v55  ;;  %3382 = vmatprep.subr.bf16.mxu0 %v3931_v56  ;;  %v3962_v55 = vld [vmem:[%s5241_s3 + $0x110] sm:$0xff]   ;;  %v3963_v56 = vld [vmem:[%s5241_s3 + $0x148] sm:$0xff]  }
 0x139   :  { %2446 = vmatprep.subr.bf16.mxu1 %v3917_v57  ;;  %v3964_v57 = vld [vmem:[%s5241_s3 + $0x108] sm:$0xff]  }
 0x13b   :  { %3383 = vmatpush3.bf16.msra.mxu0 %v3932_v58  ;;  %v3965_v58 = vld [vmem:[%s5241_s3 + $0x140] sm:$0xff]  }
 0x13c   :  { %2447 = vmatpush2.bf16.msra.mxu1 %v3915_v62  ;;  %3384 = vmatprep.subr.bf16.mxu0 %v3933_v63  ;;  %v576_v62 = vsub.s32 2, %v4147_v36  ;;  %v580_v63 = vsub.s32 3, %v4147_v36 }
 0x13d   :  { %2448 = vmatprep.subr.bf16.mxu1 %v3922_v1 }
 0x13e   :  { %v577_v1 = vrot.slane %v5106_v0, %v576_v62  ;;  %v581_v2 = vrot.slane %v5106_v0, %v580_v63 }
 0x13f   :  { %3385 = vmatpush3.bf16.msra.mxu0 %v3934_v23 }
 0x140   :  { %2449 = vmatpush2.bf16.msra.mxu1 %v3920_v4  ;;  %3392 = vmatprep.subr.bf16.mxu0 %v3935_v5 }
 0x141   :  { %3414 = vmatprep.subr.bf16.mxu1 %v3951_v30 }
 0x143   :  { %v2206_v10 = vpop.f32.mrf.mxu1  ;;  %2451 = vmatmul.mubr.bf16.vlgmr.msra.gmra.mxu1 %v4206_v60  ;;  %v3937_v60 = vld [vmem:[%s5241_s3 + $0xf0] sm:$0xff]  }
 0x144   :  { %v2207_v12 = vadd.f32 %v2206_v10, %v2166_v9  ;;  %3415 = vmatpush3.bf16.msra.mxu1 %v3952_v31 }
 0x145   :  { %v2208_v13 = vpop.f32.mrf.mxu1  ;;  %3416 = vmatprep.subr.bf16.mxu1 %v3953_v32 }
 0x146   :  { %v2209_v14 = vadd.f32 %v2208_v13, %v2168_v11  ;;  %3967 = vtanh.f32 %v2207_v12 }
 0x147   :  { %v2210_v15 = vpop.f32.mrf.mxu1 }
 0x148   :  { %3969 = vtanh.f32 %v2209_v14  ;;  %3417 = vmatpush3.bf16.msra.mxu1 %v3954_v38 }
 0x149   :  { %v2211_v22 = vpop.f32.mrf.mxu1  ;;  %3418 = vmatprep.subr.bf16.mxu1 %v3955_v52 }
 0x14c   :  { %3419 = vmatpush3.bf16.msra.mxu1 %v3956_v41 }
 0x14d   :  { %3420 = vmatprep.subr.bf16.mxu1 %v3957_v45 }
 0x150   :  { %3421 = vmatpush3.bf16.msra.mxu1 %v3958_v46 }
 0x151   :  { %3422 = vmatprep.subr.bf16.mxu1 %v3959_v49 }
 0x153   :  { %v3968_v17 = vpop.eup %3967 }
 0x154   :  { %v2465_v19 = vpack.c.bf16 %v3968_v17, %v3968_v17  ;;  %3423 = vmatpush3.bf16.msra.mxu1 %v3960_v50 }
 0x155   :  { %v3970_v54 = vpop.eup %3969  ;;  %3424 = vmatprep.subr.bf16.mxu1 %v3961_v53 }
 0x156   :  { %v2466_v18 = vpack.c.bf16 %v3970_v54, %v3970_v54 }
 0x158   :  { %2894 = vmatprep.mubr.bf16.mxu0 %v2466_v18  ;;  %3425 = vmatpush3.bf16.msra.mxu1 %v3962_v55 }
 0x159   :  { %2895 = vmatmul.mubr.bf16.vlgmr.msra.gmra.mxu0 %v2465_v19  ;;  %3426 = vmatprep.subr.bf16.mxu1 %v3963_v56 }
 0x15a   :  { %3393 = vmatpush3.bf16.msra.mxu0 %v3936_v16 }
 0x15b   :  { %3394 = vmatprep.subr.bf16.mxu0 %v3937_v60 }
 0x15c   :  { %3427 = vmatpush3.bf16.msra.mxu1 %v3964_v57 }
 0x15d   :  { %3428 = vmatprep.subr.bf16.mxu1 %v3965_v58 }
 0x15e   :  { %3395 = vmatpush3.bf16.msra.mxu0 %v3938_v20 }
 0x15f   :  { %3396 = vmatprep.subr.bf16.mxu0 %v3939_v21  ;;  %v584_v21 = vsub.s32 4, %v4147_v36 }
 0x160   :  { %3429 = vmatpush3.bf16.msra.mxu1 %v3966_v61 }
 0x162   :  { %v5146_v26 = vpop.f32.mrf.mxu0  ;;  %3397 = vmatpush3.bf16.msra.mxu0 %v3940_v24  ;;  %v588_v24 = vsub.s32 5, %v4147_v36 }
 0x163   :  { %3398 = vmatprep.subr.bf16.mxu0 %v3941_v25  ;;  %v2248_v23 = vadd.f32 %v5146_v26, %v577_v1  ;;  %v585_v25 = vrot.slane %v5106_v0, %v584_v21 }
 0x164   :  { %v2249_v29 = vpop.f32.mrf.mxu0  ;;  %v589_v26 = vrot.slane %v5106_v0, %v588_v24 }
 0x165   :  { %v2250_v3 = vadd.f32 %v2249_v29, %v581_v2 }
 0x166   :  { %v2251_v33 = vpop.f32.mrf.mxu0  ;;  %3399 = vmatpush3.bf16.msra.mxu0 %v3942_v27 }
 0x167   :  { %3400 = vmatprep.subr.bf16.mxu0 %v3943_v28 }
 0x168   :  { %v2252_v37 = vpop.f32.mrf.mxu0 }
 0x16a   :  { %3401 = vmatpush3.bf16.msra.mxu0 %v3944_v34 }
 0x16b   :  { %3402 = vmatprep.subr.bf16.mxu0 %v3945_v35 }
 0x16e   :  { %3403 = vmatpush3.bf16.msra.mxu0 %v3946_v39 }
 0x16f   :  { %3404 = vmatprep.subr.bf16.mxu0 %v3947_v40 }
 0x172   :  { %3405 = vmatpush3.bf16.msra.mxu0 %v3948_v42 }
 0x173   :  { %3406 = vmatprep.subr.bf16.mxu0 %v3949_v43 }
 0x176   :  { %3407 = vmatpush3.bf16.msra.mxu0 %v3950_v44  ;;  %v3305_v44 = vld [vmem:[%s5242_s4] ss:$0 sm:$0xff] }
 0x183   :  { %v2288_v59 = vpop.f32.mrf.mxu1 }
 0x184   :  { %v2289_v4 = vadd.f32 %v2288_v59, %v2248_v23 }
 0x185   :  { %v2290_v47 = vpop.f32.mrf.mxu1 }
 0x186   :  { %v2291_v6 = vadd.f32 %v2290_v47, %v2250_v3 }
 0x187   :  { %v2292_v48 = vpop.f32.mrf.mxu1 }
 0x189   :  { %v2293_v51 = vpop.f32.mrf.mxu1 }
 0x1a2   :  { %v2329_v5 = vpop.f32.mrf.mxu0 }
 0x1a3   :  { %v2330_v7 = vadd.f32 %v2329_v5, %v2289_v4 }
 0x1a4   :  { %v2331_v8 = vpop.f32.mrf.mxu0 }
 0x1a5   :  { %v2332_v9 = vadd.f32 %v2331_v8, %v2291_v6  ;;  %3971 = vtanh.f32 %v2330_v7 }
 0x1a6   :  { %v2333_v10 = vpop.f32.mrf.mxu0 }
 0x1a7   :  { %3973 = vtanh.f32 %v2332_v9 }
 0x1a8   :  { %v2334_v11 = vpop.f32.mrf.mxu0 }
 0x1b2   :  { %v3972_v12 = vpop.eup %3971 }
 0x1b3   :  { %v2467_v15 = vpack.c.bf16 %v3972_v12, %v3972_v12 }
 0x1b4   :  { %v3974_v13 = vpop.eup %3973 }
 0x1b5   :  { %v2468_v14 = vpack.c.bf16 %v3974_v13, %v3974_v13 }
 0x1b7   :  { %2934 = vmatprep.mubr.bf16.mxu0 %v2468_v14 }
 0x1b8   :  { %2935 = vmatmul.mubr.bf16.vlgmr.msra.gmra.mxu0 %v2467_v15 }
 0x1c3   :  { %v2370_v22 = vpop.f32.mrf.mxu1 }
 0x1c4   :  { %v2371_v27 = vadd.f32 %v2370_v22, %v585_v25 }
 0x1c5   :  { %v2372_v17 = vpop.f32.mrf.mxu1 }
 0x1c6   :  { %v2373_v28 = vadd.f32 %v2372_v17, %v589_v26 }
 0x1c7   :  { %v2374_v54 = vpop.f32.mrf.mxu1 }
 0x1c9   :  { %v2375_v18 = vpop.f32.mrf.mxu1 }
 0x1e2   :  { %v2411_v16 = vpop.f32.mrf.mxu0 }
 0x1e3   :  { %v2412_v29 = vadd.f32 %v2411_v16, %v2371_v27 }
 0x1e4   :  { %v2413_v19 = vpop.f32.mrf.mxu0 }
 0x1e5   :  { %v2414_v31 = vadd.f32 %v2413_v19, %v2373_v28 }
 0x1e6   :  { %v2415_v60 = vpop.f32.mrf.mxu0 }
 0x1e8   :  { %v2416_v20 = vpop.f32.mrf.mxu0 }
 0x203   :  { %v2452_v30 = vpop.f32.mrf.mxu1 }
 0x204   :  { %v2453_v32 = vadd.f32 %v2452_v30, %v2412_v29 }
 0x205   :  { %v2454_v33 = vpop.f32.mrf.mxu1 }
 0x206   :  { %v2455_v34 = vadd.f32 %v2454_v33, %v2414_v31  ;;  %3975 = vtanh.f32 %v2453_v32 }
 0x207   :  { %v2456_v35 = vpop.f32.mrf.mxu1 }
 0x208   :  { %3977 = vtanh.f32 %v2455_v34 }
 0x209   :  { %v2457_v37 = vpop.f32.mrf.mxu1 }
 0x213   :  { %v3976_v38 = vpop.eup %3975 }
 0x214   :  { %v2469_v36 = vpack.c.bf16 %v3976_v38, %v3976_v38 }
 0x215   :  { %v3978_v52 = vpop.eup %3977 }
 0x216   :  { %v2470_v39 = vpack.c.bf16 %v3978_v52, %v3978_v52 }
 0x218   :  { %2974 = vmatprep.mubr.bf16.mxu1 %v2470_v39 }
 0x219   :  { %v3386_v40 = vpop.f32.mrf.mxu0  ;;  %2975 = vmatmul.mubr.bf16.vlgmr.msra.gmra.mxu1 %v2469_v36 }
 0x21b   :  { %v3387_v0 = vpop.f32.mrf.mxu0 }
 0x21c   :  { %v3388_v41 = vadd.f32 %v3387_v0, %v3386_v40 }
 0x21d   :  { %v3389_v42 = vpop.f32.mrf.mxu0 }
 0x21e   :  { %v2897_v46 = vadd.f32 %v3388_v41, %v3305_v44 }
 0x21f   :  { %v3390_v43 = vpop.f32.mrf.mxu0 }
 0x278   :  { %v3408_v59 = vpop.f32.mrf.mxu0 }
 0x27a   :  { %v3409_v45 = vpop.f32.mrf.mxu0 }
 0x27b   :  { %v3410_v47 = vadd.f32 %v3409_v45, %v3408_v59 }
 0x27c   :  { %v3411_v48 = vpop.f32.mrf.mxu0 }
 0x27d   :  { %v2937_v49 = vadd.f32 %v3410_v47, %v2897_v46 }
 0x27e   :  { %v3412_v50 = vpop.f32.mrf.mxu0 }
 0x2d9   :  { %v3430_v51 = vpop.f32.mrf.mxu1 }
 0x2db   :  { %v3431_v53 = vpop.f32.mrf.mxu1 }
 0x2dc   :  { %v3432_v55 = vadd.f32 %v3431_v53, %v3430_v51 }
 0x2dd   :  { %v3433_v56 = vpop.f32.mrf.mxu1 }
 0x2de   :  { %v2977_v57 = vadd.f32 %v3432_v55, %v2937_v49 }
 0x2df   :  { %v3434_v58 = vpop.f32.mrf.mxu1 }
 0x2e0   :  { %2982 = vst [vmem:[#allocation2] sm:$0x3] %v2977_v57 }
 0x2e1   :  { %3990 = shalt.err (!%p3987_p4)
}
 0x2e2   :  { %2992 = dma.vmem_to_hbm [thread:$0]  %s2990_s19, 32, %s5245_s7, [#allocation3]  }
 0x2e3   :  { %3999 = dma.done.wait [#allocation3], 32  }
 0x2e4   :  { %4000 = vsyncadd [#allocation3], 4294967264 }
 0x2e5   :  { %3000 = vsyncpa [#allocation3], 1 }

</bundles_post_ra>
